<compile_context>
chip_gen: v7x
topology: tpu7x:2x2x1
jax: 0.10.0
libtpu: 0.0.40
codegen_flags: <defaults>
</compile_context>

<pallas_src>
import jax
import jax.numpy as jnp
from jax.experimental import pallas as pl
from jax.experimental.pallas import tpu as pltpu


# ---------------------------------------------------------------------------
# helpers
# ---------------------------------------------------------------------------
def _vmem_limit_bytes():
    """Per-chip VMEM limit: conservative on 64 MiB parts (v7x), larger on 128 MiB."""
    cap = 64 * 1024 * 1024
    try:
        cap = int(getattr(pltpu.get_tpu_info(), "vmem_capacity_bytes", cap))
    except Exception:
        pass
    return 96 * 1024 * 1024 if cap >= 120 * 1024 * 1024 else 32 * 1024 * 1024


def _pick_row_tile(rows, per_row_bytes, fixed_bytes, budget_bytes):
    """Largest divisor of `rows` whose estimated per-grid-step VMEM fits."""
    best = 1
    for t in range(1, rows + 1):
        if rows % t == 0 and fixed_bytes + t * per_row_bytes <= budget_bytes:
            best = t
    return best


def _halo_row_tiles(a, n_tiles, tm, halo):
    """(N, R, ...) -> (N, n_tiles, tm+halo, ...); consecutive tiles share `halo` rows.
    TODO(synk): this small halo duplication (and the parity folds / final
    un-phase transpose) remain JAX-level copies of ~activation size."""
    if n_tiles == 1:
        return a[:, None]
    return jnp.stack([a[:, i * tm:i * tm + tm + halo] for i in range(n_tiles)], axis=1)


# ---------------------------------------------------------------------------
# Pallas kernels
# ---------------------------------------------------------------------------
def _down_kernel(xq_ref, wq_ref, o_ref):
    # xq_ref: (1, 1, tm+1, Wo+1, 4*Cin) bf16  parity-folded, padded, LeakyReLU'd x
    # wq_ref: (4, 4*Cin, inner)         bf16  down-conv taps packed per (u, v) shift
    # o_ref : (1, tm, Wo, inner)        bf16  ReLU(Conv4x4_s2(...)) row tile
    tm, wo = o_ref.shape[1], o_ref.shape[2]
    acc = None
    for u in (0, 1):
        for v in (0, 1):
            a = xq_ref[0, 0, u:u + tm, v:v + wo, :].reshape(tm * wo, -1)
            p = jnp.dot(a, wq_ref[u * 2 + v], preferred_element_type=jnp.float32)
            acc = p if acc is None else acc + p
    acc = jnp.maximum(acc, 0.0)                      # fused up-branch ReLU
    o_ref[0] = acc.reshape(tm, wo, -1).astype(o_ref.dtype)


def _up_kernel(dp_ref, xph_ref, wup_ref, w1_ref, y_ref, st_ref):
    # dp_ref : (1, 1, tm+2, Wo+2, inner) bf16  padded ReLU'd down activation
    # xph_ref: (1, tm, Wo, 4*Cin)        bf16  phase-folded raw x (for the 1x1 skip)
    # wup_ref: (4, 4, inner, outer)      bf16  ConvT taps packed per (phase, tap)
    # w1_ref : (Cin, outer)              bf16  1x1 skip-conv weight
    # y_ref  : (1, tm, Wo, 8*outer)      bf16  [skip|up] x 4 phases, pre-BN / pre-bias
    # st_ref : (1, 1, 1, 2*outer)        f32   per-tile BN sums [sum | sum_sq]
    _, tm, wo, c4 = xph_ref.shape
    cin = c4 // 4
    inner = dp_ref.shape[-1]
    w1 = w1_ref[...]
    pieces, s, sq = [], None, None
    for ph in (0, 1):
        for pw in (0, 1):
            p = ph * 2 + pw
            xs = xph_ref[0, :, :, p * cin:(p + 1) * cin].reshape(tm * wo, cin)
            skip = jnp.dot(xs, w1, preferred_element_type=jnp.float32)
            up = None
            for u in (0, 1):
                for v in (0, 1):
                    a = dp_ref[0, 0, ph + u:ph + u + tm, pw + v:pw + v + wo, :]
                    t = jnp.dot(a.reshape(tm * wo, inner), wup_ref[p, u * 2 + v],
                                preferred_element_type=jnp.float32)
                    up = t if up is None else up + t
            ps = jnp.sum(up, axis=0, keepdims=True)
            pq = jnp.sum(up * up, axis=0, keepdims=True)
            s = ps if s is None else s + ps
            sq = pq if sq is None else sq + pq
            pieces += [skip, up]
    y = jnp.concatenate(pieces, axis=-1)             # (tm*Wo, 8*outer), lane-dense
    y_ref[0] = y.reshape(tm, wo, -1).astype(y_ref.dtype)
    st_ref[0, 0] = jnp.concatenate([s, sq], axis=-1)


# ---------------------------------------------------------------------------
# Module
# ---------------------------------------------------------------------------
class UnetSkipConnectionBlockPallas:
    """Innermost UnetSkipConnectionBlock (norm=BatchNorm2d => both convs bias-free,
    the 1x1 skip conv keeps its bias). BatchNorm uses batch statistics."""

    def __init__(self, outer_nc, inner_nc, input_nc=None, *, key, eps=1e-5):
        if input_nc is None:
            input_nc = outer_nc
        self.outer_nc, self.inner_nc, self.input_nc = outer_nc, inner_nc, input_nc
        self.eps = eps

        k1, k2, k3, k4 = jax.random.split(key, 4)
        s = 0.05
        # PyTorch layouts: Conv2d [out,in,kH,kW]; ConvTranspose2d [in,out,kH,kW].
        self.w_down = s * jax.random.normal(k1, (inner_nc, input_nc, 4, 4), jnp.float32)
        self.w_up = s * jax.random.normal(k2, (inner_nc, outer_nc, 4, 4), jnp.float32)
        self.w_1x1 = s * jax.random.normal(k3, (outer_nc, input_nc, 1, 1), jnp.float32)
        self.b_1x1 = s * jax.random.normal(k4, (outer_nc,), jnp.float32)
        self.bn_gamma = jnp.ones((outer_nc,), jnp.float32)
        self.bn_beta = jnp.zeros((outer_nc,), jnp.float32)

        # --- pack kernel weights once, in bf16 --------------------------------
        cin = input_nc
        # down conv: kernel tap (kh,kw) = (2u+pi, 2v+pj); rows ordered
        # (pi, pj, cin) to match the parity-folded input, one matrix per (u, v).
        wd = jnp.transpose(self.w_down, (2, 3, 1, 0))          # (kh, kw, cin, inner)
        wd = wd.reshape(2, 2, 2, 2, cin, inner_nc)             # (u, pi, v, pj, cin, inner)
        wd = jnp.transpose(wd, (0, 2, 1, 3, 4, 5))             # (u, v, pi, pj, cin, inner)
        self.wq = wd.reshape(4, 4 * cin, inner_nc).astype(jnp.bfloat16)
        # up conv (ConvTranspose 4x4 s2 p1) phase-decomposed: output phase ph with
        # input-row shift u uses kernel tap ktap[ph][u] (same for columns).
        ktap = ((3, 1), (2, 0))
        self.wup = jnp.stack(
            [jnp.stack([self.w_up[:, :, ktap[ph][u], ktap[pw][v]]
                        for u in (0, 1) for v in (0, 1)], axis=0)
             for ph in (0, 1) for pw in (0, 1)], axis=0).astype(jnp.bfloat16)
        self.w1 = jnp.transpose(self.w_1x1.reshape(outer_nc, cin)).astype(jnp.bfloat16)
        self._vmem = _vmem_limit_bytes()
        # TODO(synk): outermost / middle variants (recursive submodule, Dropout)
        # and eval-mode BN (running statistics) are not exercised by this config.

    def __call__(self, x_nchw):
        x = jnp.transpose(x_nchw, (0, 2, 3, 1)).astype(jnp.float32)   # NHWC
        N, H, W, cin = x.shape
        assert cin == self.input_nc and H % 2 == 0 and W % 2 == 0
        inner, outer = self.inner_nc, self.outer_nc
        ho, wo = H // 2, W // 2
        budget = int(0.6 * self._vmem)
        cparams = pltpu.CompilerParams(
            dimension_semantics=("parallel", "parallel"),
            vmem_limit_bytes=self._vmem)

        # ---- down: LeakyReLU(0.2) -> Conv4x4 s2 p1 (no bias) -> fused ReLU ----
        # Parity-fold the padded input so the kernel reads its 4x4 windows from a
        # (tm+1)-row halo tile instead of a 16*Cin-wide im2col materialization.
        xa = jnp.where(x > 0, x, 0.2 * x).astype(jnp.bfloat16)
        xp = jnp.pad(xa, ((0, 0), (1, 1), (1, 1), (0, 0)))
        xq = xp.reshape(N, ho + 1, 2, wo + 1, 2, cin)
        xq = jnp.transpose(xq, (0, 1, 3, 2, 4, 5)).reshape(N, ho + 1, wo + 1, 4 * cin)

        per_row_d = 2 * ((wo + 1) * 4 * cin * 2 + wo * inner * 2)
        fixed_d = 2 * (wo + 1) * 4 * cin * 2 + 2 * 4 * (4 * cin) * inner * 2
        tm_d = _pick_row_tile(ho, per_row_d, fixed_d, budget)
        n_td = ho // tm_d
        xq_t = _halo_row_tiles(xq, n_td, tm_d, halo=1)

        d = pl.pallas_call(
            _down_kernel,
            out_shape=jax.ShapeDtypeStruct((N, ho, wo, inner), jnp.bfloat16),
            grid=(N, n_td),
            in_specs=[
                pl.BlockSpec((1, 1, tm_d + 1, wo + 1, 4 * cin),
                             lambda n, i: (n, i, 0, 0, 0)),
                pl.BlockSpec((4, 4 * cin, inner), lambda n, i: (0, 0, 0)),
            ],
            out_specs=pl.BlockSpec((1, tm_d, wo, inner), lambda n, i: (n, i, 0, 0)),
            compiler_params=cparams,
        )(xq_t, self.wq)

        # ---- up: ConvT4x4 s2 p1 (no bias), phase-decomposed, fused 1x1 skip ----
        dpad = jnp.pad(d, ((0, 0), (1, 1), (1, 1), (0, 0)))
        xph = x.astype(jnp.bfloat16).reshape(N, ho, 2, wo, 2, cin)
        xph = jnp.transpose(xph, (0, 1, 3, 2, 4, 5)).reshape(N, ho, wo, 4 * cin)

        per_row_u = 2 * ((wo + 2) * inner * 2 + wo * 4 * cin * 2 + wo * 8 * outer * 2)
        fixed_u = (4 * (wo + 2) * inner * 2
                   + 2 * (16 * inner * outer + cin * outer) * 2
                   + 4 * 2 * outer * 4)
        tm_u = _pick_row_tile(ho, per_row_u, fixed_u, budget)
        n_tu = ho // tm_u
        dp_t = _halo_row_tiles(dpad, n_tu, tm_u, halo=2)

        y, stats = pl.pallas_call(
            _up_kernel,
            out_shape=(jax.ShapeDtypeStruct((N, ho, wo, 8 * outer), jnp.bfloat16),
                       jax.ShapeDtypeStruct((N, n_tu, 1, 2 * outer), jnp.float32)),
            grid=(N, n_tu),
            in_specs=[
                pl.BlockSpec((1, 1, tm_u + 2, wo + 2, inner),
                             lambda n, i: (n, i, 0, 0, 0)),
                pl.BlockSpec((1, tm_u, wo, 4 * cin), lambda n, i: (n, i, 0, 0)),
                pl.BlockSpec((4, 4, inner, outer), lambda n, i: (0, 0, 0, 0)),
                pl.BlockSpec((cin, outer), lambda n, i: (0, 0)),
            ],
            out_specs=(pl.BlockSpec((1, tm_u, wo, 8 * outer),
                                    lambda n, i: (n, i, 0, 0)),
                       pl.BlockSpec((1, 1, 1, 2 * outer), lambda n, i: (n, i, 0, 0))),
            compiler_params=cparams,
        )(dp_t, xph, self.wup, self.w1)

        # ---- BatchNorm2d (batch stats) + skip bias, fused by XLA with the ------
        # un-phase transpose (one bf16 read, one f32 write).
        tot = jnp.sum(stats, axis=(0, 1, 2))                 # (2*outer,)
        cnt = jnp.float32(N * H * W)
        mean = tot[:outer] / cnt
        var = jnp.maximum(tot[outer:] / cnt - mean * mean, 0.0)
        # TODO(synk): E[x^2]-E[x]^2 in f32; switch to Welford-style accumulation
        # if activations become large.
        sc_up = self.bn_gamma * jax.lax.rsqrt(var + self.eps)
        sh_up = self.bn_beta - mean * sc_up
        scale = jnp.concatenate([jnp.ones((outer,), jnp.float32), sc_up])
        shift = jnp.concatenate([self.b_1x1, sh_up])

        y6 = y.reshape(N, ho, wo, 2, 2, 2 * outer).astype(jnp.float32) * scale + shift
        out = jnp.transpose(y6, (0, 5, 1, 3, 2, 4)).reshape(N, 2 * outer, H, W)
        return out


# ---------------------------------------------------------------------------
# Pure-JAX reference (for numerical verification)
# ---------------------------------------------------------------------------
def _reference_forward(block, x_nchw):
    x = jnp.transpose(x_nchw, (0, 2, 3, 1)).astype(jnp.float32)      # NHWC
    outer = block.outer_nc
    # skip: Conv1x1 (with bias)
    w1 = block.w_1x1.reshape(outer, block.input_nc)
    skip = jnp.einsum('nhwc,oc->nhwo', x, w1) + block.b_1x1
    # down: LeakyReLU(0.2) -> Conv4x4 s2 p1 -> ReLU
    xa = jnp.where(x > 0, x, 0.2 * x)
    wd = jnp.transpose(block.w_down, (2, 3, 1, 0))                   # HWIO
    d = jax.lax.conv_general_dilated(xa, wd, (2, 2), [(1, 1), (1, 1)],
                                     dimension_numbers=('NHWC', 'HWIO', 'NHWC'))
    d = jnp.maximum(d, 0.0)
    # up: ConvTranspose4x4 s2 p1 == lhs-dilated conv with flipped kernel
    wu = jnp.flip(jnp.transpose(block.w_up, (2, 3, 0, 1)), axis=(0, 1))
    u = jax.lax.conv_general_dilated(d, wu, (1, 1), [(2, 2), (2, 2)],
                                     lhs_dilation=(2, 2),
                                     dimension_numbers=('NHWC', 'HWIO', 'NHWC'))
    mean = jnp.mean(u, axis=(0, 1, 2))
    var = jnp.mean((u - mean) ** 2, axis=(0, 1, 2))
    un = block.bn_gamma * (u - mean) * jax.lax.rsqrt(var + block.eps) + block.bn_beta
    out = jnp.concatenate([skip, un], axis=-1)
    return jnp.transpose(out, (0, 3, 1, 2))


# ---------------------------------------------------------------------------
if __name__ == "__main__":
    key = jax.random.PRNGKey(0)
    kx, kp = jax.random.split(key)

    outer_nc, inner_nc = 4, 8
    x = jax.random.normal(kx, (2, 4, 16, 16), jnp.float32)            # NCHW

    block = UnetSkipConnectionBlockPallas(outer_nc, inner_nc, key=kp)
    out = jax.jit(block.__call__)(x)
    jax.block_until_ready(out)

    # innermost & not outermost: out channels = outer_nc (skip) + outer_nc (model)
    assert out.shape == (2, 2 * outer_nc, 16, 16), out.shape
    assert out.dtype == jnp.float32

    # numerical check against a pure-JAX (lax conv) reference; the kernel path
    # runs the matmuls in bf16, so a loose tolerance is used.
    ref = _reference_forward(block, x)
    err = float(jnp.max(jnp.abs(out - ref)))
    assert err < 0.15, f"max abs err {err}"
    print("KERNEL_OK")
</pallas_src>

<mosaic_0001>
module attributes {stable_mosaic.version = 11 : i64} {
  func.func @_down_kernel(%arg0: i32, %arg1: i32, %arg2: memref<1x1x9x9x16xbf16, #tpu.memory_space<vmem>>, %arg3: memref<4x16x8xbf16, #tpu.memory_space<vmem>>, %arg4: memref<1x8x8x8xbf16, #tpu.memory_space<vmem>>) attributes {dimension_semantics = [#tpu.dimension_semantics<parallel>, #tpu.dimension_semantics<parallel>], iteration_bounds = array<i64: 2, 1>, scalar_prefetch = 0 : i64, scratch_operands = 0 : i64, tpu.core_type = #tpu.core_type<tc>, window_params = [{transform_indices = @transform_0, window_bounds = array<i64: 1, 1, 9, 9, 16>}, {pipeline_mode = #tpu.pipeline_mode<synchronous>, transform_indices = @transform_1, window_bounds = array<i64: 4, 16, 8>}, {transform_indices = @transform_2, window_bounds = array<i64: 1, 8, 8, 8>}]} {
    %c0 = arith.constant 0 : index
    %c0_0 = arith.constant 0 : index
    %c0_1 = arith.constant 0 : index
    %c0_2 = arith.constant 0 : index
    %c0_3 = arith.constant 0 : index
    %0 = vector.load %arg2[%c0, %c0_0, %c0_1, %c0_2, %c0_3] : memref<1x1x9x9x16xbf16, #tpu.memory_space<vmem>>, vector<1x1x8x8x16xbf16>
    %1 = vector.shape_cast %0 : vector<1x1x8x8x16xbf16> to vector<8x8x16xbf16>
    %2 = vector.shape_cast %1 : vector<8x8x16xbf16> to vector<64x16xbf16>
    %c0_4 = arith.constant 0 : index
    %c0_5 = arith.constant 0 : index
    %c0_6 = arith.constant 0 : index
    %3 = vector.load %arg3[%c0_4, %c0_5, %c0_6] : memref<4x16x8xbf16, #tpu.memory_space<vmem>>, vector<1x16x8xbf16>
    %4 = vector.shape_cast %3 : vector<1x16x8xbf16> to vector<16x8xbf16>
    %cst = arith.constant dense<0.000000e+00> : vector<64x8xf32>
    %5 = tpu.matmul %2, %4, %cst {dimension_numbers = #tpu.dot_dimension_numbers<[1], [0], [0], [1], [0, 0, 1, 1], [], []>} : vector<64x16xbf16>, vector<16x8xbf16>, vector<64x8xf32> -> vector<64x8xf32>
    %c0_7 = arith.constant 0 : index
    %c0_8 = arith.constant 0 : index
    %c0_9 = arith.constant 0 : index
    %c1 = arith.constant 1 : index
    %c0_10 = arith.constant 0 : index
    %6 = vector.load %arg2[%c0_7, %c0_8, %c0_9, %c1, %c0_10] : memref<1x1x9x9x16xbf16, #tpu.memory_space<vmem>>, vector<1x1x8x8x16xbf16>
    %7 = vector.shape_cast %6 : vector<1x1x8x8x16xbf16> to vector<8x8x16xbf16>
    %8 = vector.shape_cast %7 : vector<8x8x16xbf16> to vector<64x16xbf16>
    %c1_11 = arith.constant 1 : index
    %c0_12 = arith.constant 0 : index
    %c0_13 = arith.constant 0 : index
    %9 = vector.load %arg3[%c1_11, %c0_12, %c0_13] : memref<4x16x8xbf16, #tpu.memory_space<vmem>>, vector<1x16x8xbf16>
    %10 = vector.shape_cast %9 : vector<1x16x8xbf16> to vector<16x8xbf16>
    %cst_14 = arith.constant dense<0.000000e+00> : vector<64x8xf32>
    %11 = tpu.matmul %8, %10, %cst_14 {dimension_numbers = #tpu.dot_dimension_numbers<[1], [0], [0], [1], [0, 0, 1, 1], [], []>} : vector<64x16xbf16>, vector<16x8xbf16>, vector<64x8xf32> -> vector<64x8xf32>
    %12 = arith.addf %5, %11 : vector<64x8xf32>
    %c0_15 = arith.constant 0 : index
    %c0_16 = arith.constant 0 : index
    %c1_17 = arith.constant 1 : index
    %c0_18 = arith.constant 0 : index
    %c0_19 = arith.constant 0 : index
    %13 = vector.load %arg2[%c0_15, %c0_16, %c1_17, %c0_18, %c0_19] : memref<1x1x9x9x16xbf16, #tpu.memory_space<vmem>>, vector<1x1x8x8x16xbf16>
    %14 = vector.shape_cast %13 : vector<1x1x8x8x16xbf16> to vector<8x8x16xbf16>
    %15 = vector.shape_cast %14 : vector<8x8x16xbf16> to vector<64x16xbf16>
    %c2 = arith.constant 2 : index
    %c0_20 = arith.constant 0 : index
    %c0_21 = arith.constant 0 : index
    %16 = vector.load %arg3[%c2, %c0_20, %c0_21] : memref<4x16x8xbf16, #tpu.memory_space<vmem>>, vector<1x16x8xbf16>
    %17 = vector.shape_cast %16 : vector<1x16x8xbf16> to vector<16x8xbf16>
    %cst_22 = arith.constant dense<0.000000e+00> : vector<64x8xf32>
    %18 = tpu.matmul %15, %17, %cst_22 {dimension_numbers = #tpu.dot_dimension_numbers<[1], [0], [0], [1], [0, 0, 1, 1], [], []>} : vector<64x16xbf16>, vector<16x8xbf16>, vector<64x8xf32> -> vector<64x8xf32>
    %19 = arith.addf %12, %18 : vector<64x8xf32>
    %c0_23 = arith.constant 0 : index
    %c0_24 = arith.constant 0 : index
    %c1_25 = arith.constant 1 : index
    %c1_26 = arith.constant 1 : index
    %c0_27 = arith.constant 0 : index
    %20 = vector.load %arg2[%c0_23, %c0_24, %c1_25, %c1_26, %c0_27] : memref<1x1x9x9x16xbf16, #tpu.memory_space<vmem>>, vector<1x1x8x8x16xbf16>
    %21 = vector.shape_cast %20 : vector<1x1x8x8x16xbf16> to vector<8x8x16xbf16>
    %22 = vector.shape_cast %21 : vector<8x8x16xbf16> to vector<64x16xbf16>
    %c3 = arith.constant 3 : index
    %c0_28 = arith.constant 0 : index
    %c0_29 = arith.constant 0 : index
    %23 = vector.load %arg3[%c3, %c0_28, %c0_29] : memref<4x16x8xbf16, #tpu.memory_space<vmem>>, vector<1x16x8xbf16>
    %24 = vector.shape_cast %23 : vector<1x16x8xbf16> to vector<16x8xbf16>
    %cst_30 = arith.constant dense<0.000000e+00> : vector<64x8xf32>
    %25 = tpu.matmul %22, %24, %cst_30 {dimension_numbers = #tpu.dot_dimension_numbers<[1], [0], [0], [1], [0, 0, 1, 1], [], []>} : vector<64x16xbf16>, vector<16x8xbf16>, vector<64x8xf32> -> vector<64x8xf32>
    %26 = arith.addf %19, %25 : vector<64x8xf32>
    %cst_31 = arith.constant 0.000000e+00 : f32
    %27 = vector.broadcast %cst_31 : f32 to vector<64x8xf32>
    %28 = arith.maximumf %26, %27 : vector<64x8xf32>
    %29 = vector.shape_cast %28 : vector<64x8xf32> to vector<8x8x8xf32>
    %30 = arith.truncf %29 : vector<8x8x8xf32> to vector<8x8x8xbf16>
    %c0_32 = arith.constant 0 : index
    %c0_33 = arith.constant 0 : index
    %c0_34 = arith.constant 0 : index
    %c0_35 = arith.constant 0 : index
    %31 = vector.load %arg4[%c0_32, %c0_33, %c0_34, %c0_35] : memref<1x8x8x8xbf16, #tpu.memory_space<vmem>>, vector<1x8x8x8xbf16>
    %32 = vector.shape_cast %31 : vector<1x8x8x8xbf16> to vector<8x8x8xbf16>
    %33 = vector.shape_cast %30 : vector<8x8x8xbf16> to vector<1x8x8x8xbf16>
    tpu.vector_store %arg4[%c0_32, %c0_33, %c0_34, %c0_35], %33 {strides = array<i32>} : memref<1x8x8x8xbf16, #tpu.memory_space<vmem>>, vector<1x8x8x8xbf16>,
    return
  }
  func.func @transform_0(%arg0: i32, %arg1: i32) -> (i32, i32, i32, i32, i32) {
    %c0_i32 = arith.constant 0 : i32
    %c0_i32_0 = arith.constant 0 : i32
    %c0_i32_1 = arith.constant 0 : i32
    %c0_i32_2 = arith.constant 0 : i32
    return %arg0, %arg1, %c0_i32, %c0_i32_0, %c0_i32_1 : i32, i32, i32, i32, i32
  }
  func.func @transform_1(%arg0: i32, %arg1: i32) -> (i32, i32, i32) {
    %c0_i32 = arith.constant 0 : i32
    %c0_i32_0 = arith.constant 0 : i32
    %c0_i32_1 = arith.constant 0 : i32
    %c0_i32_2 = arith.constant 0 : i32
    return %c0_i32, %c0_i32_0, %c0_i32_1 : i32, i32, i32
  }
  func.func @transform_2(%arg0: i32, %arg1: i32) -> (i32, i32, i32, i32) {
    %c0_i32 = arith.constant 0 : i32
    %c0_i32_0 = arith.constant 0 : i32
    %c0_i32_1 = arith.constant 0 : i32
    return %arg0, %arg1, %c0_i32, %c0_i32_0 : i32, i32, i32, i32
  }
}

module attributes {stable_mosaic.version = 11 : i64} {
  func.func @_up_kernel(%arg0: i32, %arg1: i32, %arg2: memref<1x1x10x10x8xbf16, #tpu.memory_space<vmem>>, %arg3: memref<1x8x8x16xbf16, #tpu.memory_space<vmem>>, %arg4: memref<4x4x8x4xbf16, #tpu.memory_space<vmem>>, %arg5: memref<4x4xbf16, #tpu.memory_space<vmem>>, %arg6: memref<1x8x8x32xbf16, #tpu.memory_space<vmem>>, %arg7: memref<1x1x1x8xf32, #tpu.memory_space<vmem>>) attributes {dimension_semantics = [#tpu.dimension_semantics<parallel>, #tpu.dimension_semantics<parallel>], iteration_bounds = array<i64: 2, 1>, scalar_prefetch = 0 : i64, scratch_operands = 0 : i64, tpu.core_type = #tpu.core_type<tc>, window_params = [{transform_indices = @transform_0, window_bounds = array<i64: 1, 1, 10, 10, 8>}, {transform_indices = @transform_1, window_bounds = array<i64: 1, 8, 8, 16>}, {pipeline_mode = #tpu.pipeline_mode<synchronous>, transform_indices = @transform_2, window_bounds = array<i64: 4, 4, 8, 4>}, {pipeline_mode = #tpu.pipeline_mode<synchronous>, transform_indices = @transform_3, window_bounds = array<i64: 4, 4>}, {transform_indices = @transform_4, window_bounds = array<i64: 1, 8, 8, 32>}, {transform_indices = @transform_5, window_bounds = array<i64: 1, 1, 1, 8>}]} {
    %c0 = arith.constant 0 : index
    %c0_0 = arith.constant 0 : index
    %0 = vector.load %arg5[%c0, %c0_0] : memref<4x4xbf16, #tpu.memory_space<vmem>>, vector<4x4xbf16>
    %c0_1 = arith.constant 0 : index
    %c0_2 = arith.constant 0 : index
    %c0_3 = arith.constant 0 : index
    %c0_4 = arith.constant 0 : index
    %1 = vector.load %arg3[%c0_1, %c0_2, %c0_3, %c0_4] : memref<1x8x8x16xbf16, #tpu.memory_space<vmem>>, vector<1x8x8x4xbf16>
    %2 = vector.shape_cast %1 : vector<1x8x8x4xbf16> to vector<8x8x4xbf16>
    %3 = vector.shape_cast %2 : vector<8x8x4xbf16> to vector<64x4xbf16>
    %cst = arith.constant dense<0.000000e+00> : vector<64x4xf32>
    %4 = tpu.matmul %3, %0, %cst {dimension_numbers = #tpu.dot_dimension_numbers<[1], [0], [0], [1], [0, 0, 1, 1], [], []>} : vector<64x4xbf16>, vector<4x4xbf16>, vector<64x4xf32> -> vector<64x4xf32>
    %c0_5 = arith.constant 0 : index
    %c0_6 = arith.constant 0 : index
    %c0_7 = arith.constant 0 : index
    %c0_8 = arith.constant 0 : index
    %c0_9 = arith.constant 0 : index
    %5 = vector.load %arg2[%c0_5, %c0_6, %c0_7, %c0_8, %c0_9] : memref<1x1x10x10x8xbf16, #tpu.memory_space<vmem>>, vector<1x1x8x8x8xbf16>
    %6 = vector.shape_cast %5 : vector<1x1x8x8x8xbf16> to vector<8x8x8xbf16>
    %7 = vector.shape_cast %6 : vector<8x8x8xbf16> to vector<64x8xbf16>
    %c0_10 = arith.constant 0 : index
    %c0_11 = arith.constant 0 : index
    %c0_12 = arith.constant 0 : index
    %c0_13 = arith.constant 0 : index
    %8 = vector.load %arg4[%c0_10, %c0_11, %c0_12, %c0_13] : memref<4x4x8x4xbf16, #tpu.memory_space<vmem>>, vector<1x1x8x4xbf16>
    %9 = vector.shape_cast %8 : vector<1x1x8x4xbf16> to vector<8x4xbf16>
    %cst_14 = arith.constant dense<0.000000e+00> : vector<64x4xf32>
    %10 = tpu.matmul %7, %9, %cst_14 {dimension_numbers = #tpu.dot_dimension_numbers<[1], [0], [0], [1], [0, 0, 1, 1], [], []>} : vector<64x8xbf16>, vector<8x4xbf16>, vector<64x4xf32> -> vector<64x4xf32>
    %c0_15 = arith.constant 0 : index
    %c0_16 = arith.constant 0 : index
    %c0_17 = arith.constant 0 : index
    %c1 = arith.constant 1 : index
    %c0_18 = arith.constant 0 : index
    %11 = vector.load %arg2[%c0_15, %c0_16, %c0_17, %c1, %c0_18] : memref<1x1x10x10x8xbf16, #tpu.memory_space<vmem>>, vector<1x1x8x8x8xbf16>
    %12 = vector.shape_cast %11 : vector<1x1x8x8x8xbf16> to vector<8x8x8xbf16>
    %13 = vector.shape_cast %12 : vector<8x8x8xbf16> to vector<64x8xbf16>
    %c0_19 = arith.constant 0 : index
    %c1_20 = arith.constant 1 : index
    %c0_21 = arith.constant 0 : index
    %c0_22 = arith.constant 0 : index
    %14 = vector.load %arg4[%c0_19, %c1_20, %c0_21, %c0_22] : memref<4x4x8x4xbf16, #tpu.memory_space<vmem>>, vector<1x1x8x4xbf16>
    %15 = vector.shape_cast %14 : vector<1x1x8x4xbf16> to vector<8x4xbf16>
    %cst_23 = arith.constant dense<0.000000e+00> : vector<64x4xf32>
    %16 = tpu.matmul %13, %15, %cst_23 {dimension_numbers = #tpu.dot_dimension_numbers<[1], [0], [0], [1], [0, 0, 1, 1], [], []>} : vector<64x8xbf16>, vector<8x4xbf16>, vector<64x4xf32> -> vector<64x4xf32>
    %17 = arith.addf %10, %16 : vector<64x4xf32>
    %c0_24 = arith.constant 0 : index
    %c0_25 = arith.constant 0 : index
    %c1_26 = arith.constant 1 : index
    %c0_27 = arith.constant 0 : index
    %c0_28 = arith.constant 0 : index
    %18 = vector.load %arg2[%c0_24, %c0_25, %c1_26, %c0_27, %c0_28] : memref<1x1x10x10x8xbf16, #tpu.memory_space<vmem>>, vector<1x1x8x8x8xbf16>
    %19 = vector.shape_cast %18 : vector<1x1x8x8x8xbf16> to vector<8x8x8xbf16>
    %20 = vector.shape_cast %19 : vector<8x8x8xbf16> to vector<64x8xbf16>
    %c0_29 = arith.constant 0 : index
    %c2 = arith.constant 2 : index
    %c0_30 = arith.constant 0 : index
    %c0_31 = arith.constant 0 : index
    %21 = vector.load %arg4[%c0_29, %c2, %c0_30, %c0_31] : memref<4x4x8x4xbf16, #tpu.memory_space<vmem>>, vector<1x1x8x4xbf16>
    %22 = vector.shape_cast %21 : vector<1x1x8x4xbf16> to vector<8x4xbf16>
    %cst_32 = arith.constant dense<0.000000e+00> : vector<64x4xf32>
    %23 = tpu.matmul %20, %22, %cst_32 {dimension_numbers = #tpu.dot_dimension_numbers<[1], [0], [0], [1], [0, 0, 1, 1], [], []>} : vector<64x8xbf16>, vector<8x4xbf16>, vector<64x4xf32> -> vector<64x4xf32>
    %24 = arith.addf %17, %23 : vector<64x4xf32>
    %c0_33 = arith.constant 0 : index
    %c0_34 = arith.constant 0 : index
    %c1_35 = arith.constant 1 : index
    %c1_36 = arith.constant 1 : index
    %c0_37 = arith.constant 0 : index
    %25 = vector.load %arg2[%c0_33, %c0_34, %c1_35, %c1_36, %c0_37] : memref<1x1x10x10x8xbf16, #tpu.memory_space<vmem>>, vector<1x1x8x8x8xbf16>
    %26 = vector.shape_cast %25 : vector<1x1x8x8x8xbf16> to vector<8x8x8xbf16>
    %27 = vector.shape_cast %26 : vector<8x8x8xbf16> to vector<64x8xbf16>
    %c0_38 = arith.constant 0 : index
    %c3 = arith.constant 3 : index
    %c0_39 = arith.constant 0 : index
    %c0_40 = arith.constant 0 : index
    %28 = vector.load %arg4[%c0_38, %c3, %c0_39, %c0_40] : memref<4x4x8x4xbf16, #tpu.memory_space<vmem>>, vector<1x1x8x4xbf16>
    %29 = vector.shape_cast %28 : vector<1x1x8x4xbf16> to vector<8x4xbf16>
    %cst_41 = arith.constant dense<0.000000e+00> : vector<64x4xf32>
    %30 = tpu.matmul %27, %29, %cst_41 {dimension_numbers = #tpu.dot_dimension_numbers<[1], [0], [0], [1], [0, 0, 1, 1], [], []>} : vector<64x8xbf16>, vector<8x4xbf16>, vector<64x4xf32> -> vector<64x4xf32>
    %31 = arith.addf %24, %30 : vector<64x4xf32>
    %cst_42 = arith.constant dense<0.000000e+00> : vector<4xf32>
    %32 = vector.multi_reduction <add>, %31, %cst_42 [0] : vector<64x4xf32> to vector<4xf32>
    %33 = vector.shape_cast %32 : vector<4xf32> to vector<1x4xf32>
    %34 = arith.mulf %31, %31 : vector<64x4xf32>
    %cst_43 = arith.constant dense<0.000000e+00> : vector<4xf32>
    %35 = vector.multi_reduction <add>, %34, %cst_43 [0] : vector<64x4xf32> to vector<4xf32>
    %36 = vector.shape_cast %35 : vector<4xf32> to vector<1x4xf32>
    %c0_44 = arith.constant 0 : index
    %c0_45 = arith.constant 0 : index
    %c0_46 = arith.constant 0 : index
    %c4 = arith.constant 4 : index
    %37 = vector.load %arg3[%c0_44, %c0_45, %c0_46, %c4] : memref<1x8x8x16xbf16, #tpu.memory_space<vmem>>, vector<1x8x8x4xbf16>
    %38 = vector.shape_cast %37 : vector<1x8x8x4xbf16> to vector<8x8x4xbf16>
    %39 = vector.shape_cast %38 : vector<8x8x4xbf16> to vector<64x4xbf16>
    %cst_47 = arith.constant dense<0.000000e+00> : vector<64x4xf32>
    %40 = tpu.matmul %39, %0, %cst_47 {dimension_numbers = #tpu.dot_dimension_numbers<[1], [0], [0], [1], [0, 0, 1, 1], [], []>} : vector<64x4xbf16>, vector<4x4xbf16>, vector<64x4xf32> -> vector<64x4xf32>
    %c0_48 = arith.constant 0 : index
    %c0_49 = arith.constant 0 : index
    %c0_50 = arith.constant 0 : index
    %c1_51 = arith.constant 1 : index
    %c0_52 = arith.constant 0 : index
    %41 = vector.load %arg2[%c0_48, %c0_49, %c0_50, %c1_51, %c0_52] : memref<1x1x10x10x8xbf16, #tpu.memory_space<vmem>>, vector<1x1x8x8x8xbf16>
    %42 = vector.shape_cast %41 : vector<1x1x8x8x8xbf16> to vector<8x8x8xbf16>
    %43 = vector.shape_cast %42 : vector<8x8x8xbf16> to vector<64x8xbf16>
    %c1_53 = arith.constant 1 : index
    %c0_54 = arith.constant 0 : index
    %c0_55 = arith.constant 0 : index
    %c0_56 = arith.constant 0 : index
    %44 = vector.load %arg4[%c1_53, %c0_54, %c0_55, %c0_56] : memref<4x4x8x4xbf16, #tpu.memory_space<vmem>>, vector<1x1x8x4xbf16>
    %45 = vector.shape_cast %44 : vector<1x1x8x4xbf16> to vector<8x4xbf16>
    %cst_57 = arith.constant dense<0.000000e+00> : vector<64x4xf32>
    %46 = tpu.matmul %43, %45, %cst_57 {dimension_numbers = #tpu.dot_dimension_numbers<[1], [0], [0], [1], [0, 0, 1, 1], [], []>} : vector<64x8xbf16>, vector<8x4xbf16>, vector<64x4xf32> -> vector<64x4xf32>
    %c0_58 = arith.constant 0 : index
    %c0_59 = arith.constant 0 : index
    %c0_60 = arith.constant 0 : index
    %c2_61 = arith.constant 2 : index
    %c0_62 = arith.constant 0 : index
    %47 = vector.load %arg2[%c0_58, %c0_59, %c0_60, %c2_61, %c0_62] : memref<1x1x10x10x8xbf16, #tpu.memory_space<vmem>>, vector<1x1x8x8x8xbf16>
    %48 = vector.shape_cast %47 : vector<1x1x8x8x8xbf16> to vector<8x8x8xbf16>
    %49 = vector.shape_cast %48 : vector<8x8x8xbf16> to vector<64x8xbf16>
    %c1_63 = arith.constant 1 : index
    %c1_64 = arith.constant 1 : index
    %c0_65 = arith.constant 0 : index
    %c0_66 = arith.constant 0 : index
    %50 = vector.load %arg4[%c1_63, %c1_64, %c0_65, %c0_66] : memref<4x4x8x4xbf16, #tpu.memory_space<vmem>>, vector<1x1x8x4xbf16>
    %51 = vector.shape_cast %50 : vector<1x1x8x4xbf16> to vector<8x4xbf16>
    %cst_67 = arith.constant dense<0.000000e+00> : vector<64x4xf32>
    %52 = tpu.matmul %49, %51, %cst_67 {dimension_numbers = #tpu.dot_dimension_numbers<[1], [0], [0], [1], [0, 0, 1, 1], [], []>} : vector<64x8xbf16>, vector<8x4xbf16>, vector<64x4xf32> -> vector<64x4xf32>
    %53 = arith.addf %46, %52 : vector<64x4xf32>
    %c0_68 = arith.constant 0 : index
    %c0_69 = arith.constant 0 : index
    %c1_70 = arith.constant 1 : index
    %c1_71 = arith.constant 1 : index
    %c0_72 = arith.constant 0 : index
    %54 = vector.load %arg2[%c0_68, %c0_69, %c1_70, %c1_71, %c0_72] : memref<1x1x10x10x8xbf16, #tpu.memory_space<vmem>>, vector<1x1x8x8x8xbf16>
    %55 = vector.shape_cast %54 : vector<1x1x8x8x8xbf16> to vector<8x8x8xbf16>
    %56 = vector.shape_cast %55 : vector<8x8x8xbf16> to vector<64x8xbf16>
    %c1_73 = arith.constant 1 : index
    %c2_74 = arith.constant 2 : index
    %c0_75 = arith.constant 0 : index
    %c0_76 = arith.constant 0 : index
    %57 = vector.load %arg4[%c1_73, %c2_74, %c0_75, %c0_76] : memref<4x4x8x4xbf16, #tpu.memory_space<vmem>>, vector<1x1x8x4xbf16>
    %58 = vector.shape_cast %57 : vector<1x1x8x4xbf16> to vector<8x4xbf16>
    %cst_77 = arith.constant dense<0.000000e+00> : vector<64x4xf32>
    %59 = tpu.matmul %56, %58, %cst_77 {dimension_numbers = #tpu.dot_dimension_numbers<[1], [0], [0], [1], [0, 0, 1, 1], [], []>} : vector<64x8xbf16>, vector<8x4xbf16>, vector<64x4xf32> -> vector<64x4xf32>
    %60 = arith.addf %53, %59 : vector<64x4xf32>
    %c0_78 = arith.constant 0 : index
    %c0_79 = arith.constant 0 : index
    %c1_80 = arith.constant 1 : index
    %c2_81 = arith.constant 2 : index
    %c0_82 = arith.constant 0 : index
    %61 = vector.load %arg2[%c0_78, %c0_79, %c1_80, %c2_81, %c0_82] : memref<1x1x10x10x8xbf16, #tpu.memory_space<vmem>>, vector<1x1x8x8x8xbf16>
    %62 = vector.shape_cast %61 : vector<1x1x8x8x8xbf16> to vector<8x8x8xbf16>
    %63 = vector.shape_cast %62 : vector<8x8x8xbf16> to vector<64x8xbf16>
    %c1_83 = arith.constant 1 : index
    %c3_84 = arith.constant 3 : index
    %c0_85 = arith.constant 0 : index
    %c0_86 = arith.constant 0 : index
    %64 = vector.load %arg4[%c1_83, %c3_84, %c0_85, %c0_86] : memref<4x4x8x4xbf16, #tpu.memory_space<vmem>>, vector<1x1x8x4xbf16>
    %65 = vector.shape_cast %64 : vector<1x1x8x4xbf16> to vector<8x4xbf16>
    %cst_87 = arith.constant dense<0.000000e+00> : vector<64x4xf32>
    %66 = tpu.matmul %63, %65, %cst_87 {dimension_numbers = #tpu.dot_dimension_numbers<[1], [0], [0], [1], [0, 0, 1, 1], [], []>} : vector<64x8xbf16>, vector<8x4xbf16>, vector<64x4xf32> -> vector<64x4xf32>
    %67 = arith.addf %60, %66 : vector<64x4xf32>
    %cst_88 = arith.constant dense<0.000000e+00> : vector<4xf32>
    %68 = vector.multi_reduction <add>, %67, %cst_88 [0] : vector<64x4xf32> to vector<4xf32>
    %69 = vector.shape_cast %68 : vector<4xf32> to vector<1x4xf32>
    %70 = arith.mulf %67, %67 : vector<64x4xf32>
    %cst_89 = arith.constant dense<0.000000e+00> : vector<4xf32>
    %71 = vector.multi_reduction <add>, %70, %cst_89 [0] : vector<64x4xf32> to vector<4xf32>
    %72 = vector.shape_cast %71 : vector<4xf32> to vector<1x4xf32>
    %73 = arith.addf %33, %69 : vector<1x4xf32>
    %74 = arith.addf %36, %72 : vector<1x4xf32>
    %c0_90 = arith.constant 0 : index
    %c0_91 = arith.constant 0 : index
    %c0_92 = arith.constant 0 : index
    %c8 = arith.constant 8 : index
    %75 = vector.load %arg3[%c0_90, %c0_91, %c0_92, %c8] : memref<1x8x8x16xbf16, #tpu.memory_space<vmem>>, vector<1x8x8x4xbf16>
    %76 = vector.shape_cast %75 : vector<1x8x8x4xbf16> to vector<8x8x4xbf16>
    %77 = vector.shape_cast %76 : vector<8x8x4xbf16> to vector<64x4xbf16>
    %cst_93 = arith.constant dense<0.000000e+00> : vector<64x4xf32>
    %78 = tpu.matmul %77, %0, %cst_93 {dimension_numbers = #tpu.dot_dimension_numbers<[1], [0], [0], [1], [0, 0, 1, 1], [], []>} : vector<64x4xbf16>, vector<4x4xbf16>, vector<64x4xf32> -> vector<64x4xf32>
    %c0_94 = arith.constant 0 : index
    %c0_95 = arith.constant 0 : index
    %c1_96 = arith.constant 1 : index
    %c0_97 = arith.constant 0 : index
    %c0_98 = arith.constant 0 : index
    %79 = vector.load %arg2[%c0_94, %c0_95, %c1_96, %c0_97, %c0_98] : memref<1x1x10x10x8xbf16, #tpu.memory_space<vmem>>, vector<1x1x8x8x8xbf16>
    %80 = vector.shape_cast %79 : vector<1x1x8x8x8xbf16> to vector<8x8x8xbf16>
    %81 = vector.shape_cast %80 : vector<8x8x8xbf16> to vector<64x8xbf16>
    %c2_99 = arith.constant 2 : index
    %c0_100 = arith.constant 0 : index
    %c0_101 = arith.constant 0 : index
    %c0_102 = arith.constant 0 : index
    %82 = vector.load %arg4[%c2_99, %c0_100, %c0_101, %c0_102] : memref<4x4x8x4xbf16, #tpu.memory_space<vmem>>, vector<1x1x8x4xbf16>
    %83 = vector.shape_cast %82 : vector<1x1x8x4xbf16> to vector<8x4xbf16>
    %cst_103 = arith.constant dense<0.000000e+00> : vector<64x4xf32>
    %84 = tpu.matmul %81, %83, %cst_103 {dimension_numbers = #tpu.dot_dimension_numbers<[1], [0], [0], [1], [0, 0, 1, 1], [], []>} : vector<64x8xbf16>, vector<8x4xbf16>, vector<64x4xf32> -> vector<64x4xf32>
    %c0_104 = arith.constant 0 : index
    %c0_105 = arith.constant 0 : index
    %c1_106 = arith.constant 1 : index
    %c1_107 = arith.constant 1 : index
    %c0_108 = arith.constant 0 : index
    %85 = vector.load %arg2[%c0_104, %c0_105, %c1_106, %c1_107, %c0_108] : memref<1x1x10x10x8xbf16, #tpu.memory_space<vmem>>, vector<1x1x8x8x8xbf16>
    %86 = vector.shape_cast %85 : vector<1x1x8x8x8xbf16> to vector<8x8x8xbf16>
    %87 = vector.shape_cast %86 : vector<8x8x8xbf16> to vector<64x8xbf16>
    %c2_109 = arith.constant 2 : index
    %c1_110 = arith.constant 1 : index
    %c0_111 = arith.constant 0 : index
    %c0_112 = arith.constant 0 : index
    %88 = vector.load %arg4[%c2_109, %c1_110, %c0_111, %c0_112] : memref<4x4x8x4xbf16, #tpu.memory_space<vmem>>, vector<1x1x8x4xbf16>
    %89 = vector.shape_cast %88 : vector<1x1x8x4xbf16> to vector<8x4xbf16>
    %cst_113 = arith.constant dense<0.000000e+00> : vector<64x4xf32>
    %90 = tpu.matmul %87, %89, %cst_113 {dimension_numbers = #tpu.dot_dimension_numbers<[1], [0], [0], [1], [0, 0, 1, 1], [], []>} : vector<64x8xbf16>, vector<8x4xbf16>, vector<64x4xf32> -> vector<64x4xf32>
    %91 = arith.addf %84, %90 : vector<64x4xf32>
    %c0_114 = arith.constant 0 : index
    %c0_115 = arith.constant 0 : index
    %c2_116 = arith.constant 2 : index
    %c0_117 = arith.constant 0 : index
    %c0_118 = arith.constant 0 : index
    %92 = vector.load %arg2[%c0_114, %c0_115, %c2_116, %c0_117, %c0_118] : memref<1x1x10x10x8xbf16, #tpu.memory_space<vmem>>, vector<1x1x8x8x8xbf16>
    %93 = vector.shape_cast %92 : vector<1x1x8x8x8xbf16> to vector<8x8x8xbf16>
    %94 = vector.shape_cast %93 : vector<8x8x8xbf16> to vector<64x8xbf16>
    %c2_119 = arith.constant 2 : index
    %c2_120 = arith.constant 2 : index
    %c0_121 = arith.constant 0 : index
    %c0_122 = arith.constant 0 : index
    %95 = vector.load %arg4[%c2_119, %c2_120, %c0_121, %c0_122] : memref<4x4x8x4xbf16, #tpu.memory_space<vmem>>, vector<1x1x8x4xbf16>
    %96 = vector.shape_cast %95 : vector<1x1x8x4xbf16> to vector<8x4xbf16>
    %cst_123 = arith.constant dense<0.000000e+00> : vector<64x4xf32>
    %97 = tpu.matmul %94, %96, %cst_123 {dimension_numbers = #tpu.dot_dimension_numbers<[1], [0], [0], [1], [0, 0, 1, 1], [], []>} : vector<64x8xbf16>, vector<8x4xbf16>, vector<64x4xf32> -> vector<64x4xf32>
    %98 = arith.addf %91, %97 : vector<64x4xf32>
    %c0_124 = arith.constant 0 : index
    %c0_125 = arith.constant 0 : index
    %c2_126 = arith.constant 2 : index
    %c1_127 = arith.constant 1 : index
    %c0_128 = arith.constant 0 : index
    %99 = vector.load %arg2[%c0_124, %c0_125, %c2_126, %c1_127, %c0_128] : memref<1x1x10x10x8xbf16, #tpu.memory_space<vmem>>, vector<1x1x8x8x8xbf16>
    %100 = vector.shape_cast %99 : vector<1x1x8x8x8xbf16> to vector<8x8x8xbf16>
    %101 = vector.shape_cast %100 : vector<8x8x8xbf16> to vector<64x8xbf16>
    %c2_129 = arith.constant 2 : index
    %c3_130 = arith.constant 3 : index
    %c0_131 = arith.constant 0 : index
    %c0_132 = arith.constant 0 : index
    %102 = vector.load %arg4[%c2_129, %c3_130, %c0_131, %c0_132] : memref<4x4x8x4xbf16, #tpu.memory_space<vmem>>, vector<1x1x8x4xbf16>
    %103 = vector.shape_cast %102 : vector<1x1x8x4xbf16> to vector<8x4xbf16>
    %cst_133 = arith.constant dense<0.000000e+00> : vector<64x4xf32>
    %104 = tpu.matmul %101, %103, %cst_133 {dimension_numbers = #tpu.dot_dimension_numbers<[1], [0], [0], [1], [0, 0, 1, 1], [], []>} : vector<64x8xbf16>, vector<8x4xbf16>, vector<64x4xf32> -> vector<64x4xf32>
    %105 = arith.addf %98, %104 : vector<64x4xf32>
    %cst_134 = arith.constant dense<0.000000e+00> : vector<4xf32>
    %106 = vector.multi_reduction <add>, %105, %cst_134 [0] : vector<64x4xf32> to vector<4xf32>
    %107 = vector.shape_cast %106 : vector<4xf32> to vector<1x4xf32>
    %108 = arith.mulf %105, %105 : vector<64x4xf32>
    %cst_135 = arith.constant dense<0.000000e+00> : vector<4xf32>
    %109 = vector.multi_reduction <add>, %108, %cst_135 [0] : vector<64x4xf32> to vector<4xf32>
    %110 = vector.shape_cast %109 : vector<4xf32> to vector<1x4xf32>
    %111 = arith.addf %73, %107 : vector<1x4xf32>
    %112 = arith.addf %74, %110 : vector<1x4xf32>
    %c0_136 = arith.constant 0 : index
    %c0_137 = arith.constant 0 : index
    %c0_138 = arith.constant 0 : index
    %c12 = arith.constant 12 : index
    %113 = vector.load %arg3[%c0_136, %c0_137, %c0_138, %c12] : memref<1x8x8x16xbf16, #tpu.memory_space<vmem>>, vector<1x8x8x4xbf16>
    %114 = vector.shape_cast %113 : vector<1x8x8x4xbf16> to vector<8x8x4xbf16>
    %115 = vector.shape_cast %114 : vector<8x8x4xbf16> to vector<64x4xbf16>
    %cst_139 = arith.constant dense<0.000000e+00> : vector<64x4xf32>
    %116 = tpu.matmul %115, %0, %cst_139 {dimension_numbers = #tpu.dot_dimension_numbers<[1], [0], [0], [1], [0, 0, 1, 1], [], []>} : vector<64x4xbf16>, vector<4x4xbf16>, vector<64x4xf32> -> vector<64x4xf32>
    %c0_140 = arith.constant 0 : index
    %c0_141 = arith.constant 0 : index
    %c1_142 = arith.constant 1 : index
    %c1_143 = arith.constant 1 : index
    %c0_144 = arith.constant 0 : index
    %117 = vector.load %arg2[%c0_140, %c0_141, %c1_142, %c1_143, %c0_144] : memref<1x1x10x10x8xbf16, #tpu.memory_space<vmem>>, vector<1x1x8x8x8xbf16>
    %118 = vector.shape_cast %117 : vector<1x1x8x8x8xbf16> to vector<8x8x8xbf16>
    %119 = vector.shape_cast %118 : vector<8x8x8xbf16> to vector<64x8xbf16>
    %c3_145 = arith.constant 3 : index
    %c0_146 = arith.constant 0 : index
    %c0_147 = arith.constant 0 : index
    %c0_148 = arith.constant 0 : index
    %120 = vector.load %arg4[%c3_145, %c0_146, %c0_147, %c0_148] : memref<4x4x8x4xbf16, #tpu.memory_space<vmem>>, vector<1x1x8x4xbf16>
    %121 = vector.shape_cast %120 : vector<1x1x8x4xbf16> to vector<8x4xbf16>
    %cst_149 = arith.constant dense<0.000000e+00> : vector<64x4xf32>
    %122 = tpu.matmul %119, %121, %cst_149 {dimension_numbers = #tpu.dot_dimension_numbers<[1], [0], [0], [1], [0, 0, 1, 1], [], []>} : vector<64x8xbf16>, vector<8x4xbf16>, vector<64x4xf32> -> vector<64x4xf32>
    %c0_150 = arith.constant 0 : index
    %c0_151 = arith.constant 0 : index
    %c1_152 = arith.constant 1 : index
    %c2_153 = arith.constant 2 : index
    %c0_154 = arith.constant 0 : index
    %123 = vector.load %arg2[%c0_150, %c0_151, %c1_152, %c2_153, %c0_154] : memref<1x1x10x10x8xbf16, #tpu.memory_space<vmem>>, vector<1x1x8x8x8xbf16>
    %124 = vector.shape_cast %123 : vector<1x1x8x8x8xbf16> to vector<8x8x8xbf16>
    %125 = vector.shape_cast %124 : vector<8x8x8xbf16> to vector<64x8xbf16>
    %c3_155 = arith.constant 3 : index
    %c1_156 = arith.constant 1 : index
    %c0_157 = arith.constant 0 : index
    %c0_158 = arith.constant 0 : index
    %126 = vector.load %arg4[%c3_155, %c1_156, %c0_157, %c0_158] : memref<4x4x8x4xbf16, #tpu.memory_space<vmem>>, vector<1x1x8x4xbf16>
    %127 = vector.shape_cast %126 : vector<1x1x8x4xbf16> to vector<8x4xbf16>
    %cst_159 = arith.constant dense<0.000000e+00> : vector<64x4xf32>
    %128 = tpu.matmul %125, %127, %cst_159 {dimension_numbers = #tpu.dot_dimension_numbers<[1], [0], [0], [1], [0, 0, 1, 1], [], []>} : vector<64x8xbf16>, vector<8x4xbf16>, vector<64x4xf32> -> vector<64x4xf32>
    %129 = arith.addf %122, %128 : vector<64x4xf32>
    %c0_160 = arith.constant 0 : index
    %c0_161 = arith.constant 0 : index
    %c2_162 = arith.constant 2 : index
    %c1_163 = arith.constant 1 : index
    %c0_164 = arith.constant 0 : index
    %130 = vector.load %arg2[%c0_160, %c0_161, %c2_162, %c1_163, %c0_164] : memref<1x1x10x10x8xbf16, #tpu.memory_space<vmem>>, vector<1x1x8x8x8xbf16>
    %131 = vector.shape_cast %130 : vector<1x1x8x8x8xbf16> to vector<8x8x8xbf16>
    %132 = vector.shape_cast %131 : vector<8x8x8xbf16> to vector<64x8xbf16>
    %c3_165 = arith.constant 3 : index
    %c2_166 = arith.constant 2 : index
    %c0_167 = arith.constant 0 : index
    %c0_168 = arith.constant 0 : index
    %133 = vector.load %arg4[%c3_165, %c2_166, %c0_167, %c0_168] : memref<4x4x8x4xbf16, #tpu.memory_space<vmem>>, vector<1x1x8x4xbf16>
    %134 = vector.shape_cast %133 : vector<1x1x8x4xbf16> to vector<8x4xbf16>
    %cst_169 = arith.constant dense<0.000000e+00> : vector<64x4xf32>
    %135 = tpu.matmul %132, %134, %cst_169 {dimension_numbers = #tpu.dot_dimension_numbers<[1], [0], [0], [1], [0, 0, 1, 1], [], []>} : vector<64x8xbf16>, vector<8x4xbf16>, vector<64x4xf32> -> vector<64x4xf32>
    %136 = arith.addf %129, %135 : vector<64x4xf32>
    %c0_170 = arith.constant 0 : index
    %c0_171 = arith.constant 0 : index
    %c2_172 = arith.constant 2 : index
    %c2_173 = arith.constant 2 : index
    %c0_174 = arith.constant 0 : index
    %137 = vector.load %arg2[%c0_170, %c0_171, %c2_172, %c2_173, %c0_174] : memref<1x1x10x10x8xbf16, #tpu.memory_space<vmem>>, vector<1x1x8x8x8xbf16>
    %138 = vector.shape_cast %137 : vector<1x1x8x8x8xbf16> to vector<8x8x8xbf16>
    %139 = vector.shape_cast %138 : vector<8x8x8xbf16> to vector<64x8xbf16>
    %c3_175 = arith.constant 3 : index
    %c3_176 = arith.constant 3 : index
    %c0_177 = arith.constant 0 : index
    %c0_178 = arith.constant 0 : index
    %140 = vector.load %arg4[%c3_175, %c3_176, %c0_177, %c0_178] : memref<4x4x8x4xbf16, #tpu.memory_space<vmem>>, vector<1x1x8x4xbf16>
    %141 = vector.shape_cast %140 : vector<1x1x8x4xbf16> to vector<8x4xbf16>
    %cst_179 = arith.constant dense<0.000000e+00> : vector<64x4xf32>
    %142 = tpu.matmul %139, %141, %cst_179 {dimension_numbers = #tpu.dot_dimension_numbers<[1], [0], [0], [1], [0, 0, 1, 1], [], []>} : vector<64x8xbf16>, vector<8x4xbf16>, vector<64x4xf32> -> vector<64x4xf32>
    %143 = arith.addf %136, %142 : vector<64x4xf32>
    %cst_180 = arith.constant dense<0.000000e+00> : vector<4xf32>
    %144 = vector.multi_reduction <add>, %143, %cst_180 [0] : vector<64x4xf32> to vector<4xf32>
    %145 = vector.shape_cast %144 : vector<4xf32> to vector<1x4xf32>
    %146 = arith.mulf %143, %143 : vector<64x4xf32>
    %cst_181 = arith.constant dense<0.000000e+00> : vector<4xf32>
    %147 = vector.multi_reduction <add>, %146, %cst_181 [0] : vector<64x4xf32> to vector<4xf32>
    %148 = vector.shape_cast %147 : vector<4xf32> to vector<1x4xf32>
    %149 = arith.addf %111, %145 : vector<1x4xf32>
    %150 = arith.addf %112, %148 : vector<1x4xf32>
    %151 = tpu.concatenate %4, %31, %40, %67, %78, %105, %116, %143 in 1 : vector<64x4xf32>, vector<64x4xf32>, vector<64x4xf32>, vector<64x4xf32>, vector<64x4xf32>, vector<64x4xf32>, vector<64x4xf32>, vector<64x4xf32> -> vector<64x32xf32>
    %152 = vector.shape_cast %151 : vector<64x32xf32> to vector<8x8x32xf32>
    %153 = arith.truncf %152 : vector<8x8x32xf32> to vector<8x8x32xbf16>
    %c0_182 = arith.constant 0 : index
    %c0_183 = arith.constant 0 : index
    %c0_184 = arith.constant 0 : index
    %c0_185 = arith.constant 0 : index
    %154 = vector.load %arg6[%c0_182, %c0_183, %c0_184, %c0_185] : memref<1x8x8x32xbf16, #tpu.memory_space<vmem>>, vector<1x8x8x32xbf16>
    %155 = vector.shape_cast %154 : vector<1x8x8x32xbf16> to vector<8x8x32xbf16>
    %156 = vector.shape_cast %153 : vector<8x8x32xbf16> to vector<1x8x8x32xbf16>
    tpu.vector_store %arg6[%c0_182, %c0_183, %c0_184, %c0_185], %156 {strides = array<i32>} : memref<1x8x8x32xbf16, #tpu.memory_space<vmem>>, vector<1x8x8x32xbf16>,
    %157 = tpu.concatenate %149, %150 in 1 : vector<1x4xf32>, vector<1x4xf32> -> vector<1x8xf32>
    %c0_186 = arith.constant 0 : index
    %c0_187 = arith.constant 0 : index
    %c0_188 = arith.constant 0 : index
    %c0_189 = arith.constant 0 : index
    %158 = vector.load %arg7[%c0_186, %c0_187, %c0_188, %c0_189] : memref<1x1x1x8xf32, #tpu.memory_space<vmem>>, vector<1x1x1x8xf32>
    %159 = vector.shape_cast %158 : vector<1x1x1x8xf32> to vector<1x8xf32>
    %160 = vector.shape_cast %157 : vector<1x8xf32> to vector<1x1x1x8xf32>
    tpu.vector_store %arg7[%c0_186, %c0_187, %c0_188, %c0_189], %160 {strides = array<i32>} : memref<1x1x1x8xf32, #tpu.memory_space<vmem>>, vector<1x1x1x8xf32>,
    return
  }
  func.func @transform_0(%arg0: i32, %arg1: i32) -> (i32, i32, i32, i32, i32) {
    %c0_i32 = arith.constant 0 : i32
    %c0_i32_0 = arith.constant 0 : i32
    %c0_i32_1 = arith.constant 0 : i32
    %c0_i32_2 = arith.constant 0 : i32
    return %arg0, %arg1, %c0_i32, %c0_i32_0, %c0_i32_1 : i32, i32, i32, i32, i32
  }
  func.func @transform_1(%arg0: i32, %arg1: i32) -> (i32, i32, i32, i32) {
    %c0_i32 = arith.constant 0 : i32
    %c0_i32_0 = arith.constant 0 : i32
    %c0_i32_1 = arith.constant 0 : i32
    return %arg0, %arg1, %c0_i32, %c0_i32_0 : i32, i32, i32, i32
  }
  func.func @transform_2(%arg0: i32, %arg1: i32) -> (i32, i32, i32, i32) {
    %c0_i32 = arith.constant 0 : i32
    %c0_i32_0 = arith.constant 0 : i32
    %c0_i32_1 = arith.constant 0 : i32
    %c0_i32_2 = arith.constant 0 : i32
    %c0_i32_3 = arith.constant 0 : i32
    return %c0_i32, %c0_i32_0, %c0_i32_1, %c0_i32_2 : i32, i32, i32, i32
  }
  func.func @transform_3(%arg0: i32, %arg1: i32) -> (i32, i32) {
    %c0_i32 = arith.constant 0 : i32
    %c0_i32_0 = arith.constant 0 : i32
    %c0_i32_1 = arith.constant 0 : i32
    return %c0_i32, %c0_i32_0 : i32, i32
  }
  func.func @transform_4(%arg0: i32, %arg1: i32) -> (i32, i32, i32, i32) {
    %c0_i32 = arith.constant 0 : i32
    %c0_i32_0 = arith.constant 0 : i32
    %c0_i32_1 = arith.constant 0 : i32
    return %arg0, %arg1, %c0_i32, %c0_i32_0 : i32, i32, i32, i32
  }
  func.func @transform_5(%arg0: i32, %arg1: i32) -> (i32, i32, i32, i32) {
    %c0_i32 = arith.constant 0 : i32
    %c0_i32_0 = arith.constant 0 : i32
    %c0_i32_1 = arith.constant 0 : i32
    return %arg0, %arg1, %c0_i32, %c0_i32_0 : i32, i32, i32, i32
  }
}

</mosaic_0001>

<bundles_post_ra>
// kernel: a_call__.2
= control target key start
LH: loop header
LB: loop body
LE: loop exit
PB: predicated region body
PF: predicated region fallthrough
CT: control target
= control target key end

     0   :  { %s1226_s9 = smov 0   ;;  %s1228_s10 = smov 0   ;;  %s1429_s0 = inlined_call_operand.vmem [shape: bf16[2,1,9,9,16], index: 0, kind: input, shape index: {}]   ;;  %s1430_s1 = inlined_call_operand.vmem [shape: bf16[4,16,8], index: 1, kind: input, shape index: {}]   ;;  %s1431_s2 = inlined_call_operand.vmem [shape: bf16[2,8,8,8], index: 2, kind: output, shape index: {}]  }
   0x1   :  { %s1230_s11 = smov 0  }
   0x2 LB: > { %s24_s12 = sadd.s32 1, %s1205_s10  ;;  %p993_p0 = scmp.ge.s32.totalorder %s1209_s11, 1  ;;  %s1209_s11 = sphi %s1230_s11, %s12_s11   ;;  %s1205_s10 = sphi %s1228_s10, %s1435_s10   ;;  %s1201_s9 = sphi %s1226_s9, %s1434_s9  }
   0x3   : > { %p26_p1 = scmp.ge.s32.totalorder %s24_s12, 2  ;;  %p132_p2 = scmp.lt.s32.totalorder %s1209_s11, 3 }
   0x5   : > { %s1437_s12 = smov (%p26_p1, %s24_s12), 0  ;;  %p133_p3 = pnand %p993_p0, %p132_p2 }
   0x6   : > { %v1175_v0 = vld [vmem:[%s1430_s1 + $0x10] sm:$0xff] (!%p133_p3)   ;;  %p162_p4 = scmp.lt.s32.totalorder (!%p133_p3), %s1201_s9, 1  ;;  %v1178_v1 = vld [vmem:[%s1430_s1 + $0x8] sm:$0xff] (!%p133_p3)   ;;  %v1255_v2 = vld [vmem:[%s1430_s1] sm:$0xff] (!%p133_p3)   ;;  %vm336_vm0 = vcmask (!%p133_p3), 130048   ;;  %vm890_vm4 = vcmask (!%p133_p3), 60416  }
   0x7   : > { %136 = sbr.rel (%p133_p3) target bundleno = 295 (0x127), region = 28  ;;  %1106 = vmatprep.subr.bf16.mxu0 (!%p133_p3), %v1175_v0  ;;  %1086 = vmatprep.subr.bf16.mxu1 (!%p133_p3), %v1178_v1  ;;  %v1182_v3 = vld [vmem:[%s1430_s1 + $0x18] sm:$0xff] (!%p133_p3)   ;;  %vm200_vm1 = vsmask.f32 (!%p133_p3), 3328  ;;  %vm201_vm2 = vsmask.f32 (!%p133_p3), 7440 }
   0x8   : > { %1107 = vmatpush3.bf16.msra.mxu0 (!%p133_p3), %v1175_v0  ;;  %1087 = vmatpush3.bf16.msra.mxu1 (!%p133_p3), %v1178_v1  ;;  %vm1298_vm3 = vmor (!%p133_p3), %vm200_vm1, %vm201_vm2 }
   0x9   : > { %1096 = vmatprep.subr.bf16.mxu1 (!%p133_p3), %v1255_v2  ;;  %1116 = vmatprep.subr.bf16.mxu0 (!%p133_p3), %v1182_v3 }
   0xe   : > { %s1439_s9 = smov (!%p162_p4, %s1201_s9), 1 }
   0xf   : > { %s1150_s19 = smul.u32 72, %s1439_s9  ;;  %s1065_s25 = sshll.u32 %s1439_s9, 5 }
  0x10   : > { %s1402_s28 = scalar_lea.vmem %s1431_s2, %s1065_s25 }
  0x11   : > { %s1265_s24 = scalar_lea.vmem %s1429_s0, %s1150_s19 }
  0x12   : > { %v1176_v4 = vld [vmem:[%s1265_s24 + $0x8] ss:$8 sps:$4 sm:$0xff]   ;;  %v1177_v5 = vld [vmem:[%s1265_s24 + $0x18] ss:$8 sps:$4 sm:$0xff]   ;;  %v192_v9 = vld [vmem:[%s1265_s24 + $0x4] sm:$0x1] }
  0x13   : > { %1108 = vmatprep.mubr.msk.bf16.mxu0 %vm336_vm0, %v1176_v4  ;;  %v1179_v6 = vld [vmem:[%s1265_s24 + $0x28] ss:$8 sps:$4 sm:$0xff]   ;;  %v1273_v7 = vld [vmem:[%s1265_s24] sm:$0xf]  ;;  %v193_v10 = vld [vmem:[%s1265_s24 + $0xc] sm:$0x1] }
  0x14   : > { %1109 = vmatmul.mubr.msk.bf16.vlgmr.msra.gmra.mrb[0].mxu0 %vm336_vm0, %v1177_v5  ;;  %v1276_v8 = vld [vmem:[%s1265_s24 + $0x8] sm:$0xf]  ;;  %v204_v11 = vshrl.u32 %v1273_v7, 16  ;;  %v207_v12 = vshll.u32 %v1273_v7, 16  ;;  %v213_v13 = vshll.u32 %v192_v9, 16  ;;  %v227_v16 = vshll.u32 %v193_v10, 16 }
  0x15   : > { %1112 = vmatprep.mubr.msk.bf16.mxu0 %vm336_vm0, %v1179_v6  ;;  %v218_v14 = vshrl.u32 %v1276_v8, 16  ;;  %1117 = vmatpush3.bf16.msra.mxu0 %v1182_v3  ;;  %v221_v15 = vshll.u32 %v1276_v8, 16  ;;  %v1181_v21 = vld [vmem:[%s1265_s24 + $0x38] ss:$8 sps:$4 sm:$0xff]   ;;  %v1287_v24 = vld [vmem:[%s1265_s24 + $0x10] sm:$0xf] }
  0x16   : > { %v206_v17 = vrot.slane %v204_v11, 4  ;;  %v209_v18 = vrot.slane %v207_v12, 5  ;;  %v215_v19 = vrot.slane %v213_v13, 5  ;;  %v229_v23 = vrot.slane %v227_v16, 5  ;;  %v1290_v25 = vld [vmem:[%s1265_s24 + $0x18] sm:$0xf] }
  0x17   : > { %v220_v20 = vrot.slane %v218_v14, 4  ;;  %v223_v22 = vrot.slane %v221_v15, 5  ;;  %v194_v27 = vld [vmem:[%s1265_s24 + $0x14] sm:$0x1]  ;;  %v195_v28 = vld [vmem:[%s1265_s24 + $0x1c] sm:$0x1] }
  0x18   : > { %v210_v26 = vor.u32 %v209_v18, %v206_v17  ;;  %v232_v29 = vshrl.u32 %v1287_v24, 16  ;;  %v235_v30 = vshll.u32 %v1287_v24, 16  ;;  %v241_v33 = vshll.u32 %v194_v27, 16  ;;  %v1036_v36 = vld [vmem:[%s1265_s24 + $0x8] sm:$0xf] }
  0x19   : > { %v224_v32 = vor.u32 %v223_v22, %v220_v20  ;;  %v246_v34 = vshrl.u32 %v1290_v25, 16  ;;  %v249_v35 = vshll.u32 %v1290_v25, 16  ;;  %v255_v40 = vshll.u32 %v195_v28, 16  ;;  %v1037_v41 = vld [vmem:[%s1265_s24 + $0xc] sm:$0x1] }
  0x1a   : > { %v211_v37 = vrot.slane %v210_v26, 4  ;;  %v234_v38 = vrot.slane %v232_v29, 4  ;;  %v237_v39 = vrot.slane %v235_v30, 5  ;;  %v243_v43 = vrot.slane %v241_v33, 5  ;;  %v1038_v46 = vld [vmem:[%s1265_s24 + $0x10] sm:$0xf] }
  0x1b   : > { %v225_v42 = vrot.slane %v224_v32, 4  ;;  %v248_v44 = vrot.slane %v246_v34, 4  ;;  %v251_v45 = vrot.slane %v249_v35, 5  ;;  %v257_v49 = vrot.slane %v255_v40, 5  ;;  %v1039_v53 = vld [vmem:[%s1265_s24 + $0x14] sm:$0x1] }
  0x1c   : > { %1113 = vmatmul.mubr.msk.bf16.gmra.mrb[4].mxu0 %vm336_vm0, %v1181_v21  ;;  %v216_v47 = vsel %vm1298_vm3, %v211_v37, %v215_v19  ;;  %v238_v48 = vor.u32 %v237_v39, %v234_v38  ;;  %v657_v50 = vshrl.u32 %v1036_v36, 16  ;;  %v660_v54 = vshll.u32 %v1036_v36, 16  ;;  %v1314_v56 = vld [vmem:[%s1265_s24 + $0x20] sm:$0xf]  ;;  %v196_v1 = vld [vmem:[%s1265_s24 + $0x24] sm:$0x1] }
  0x1d   : > { %v230_v51 = vsel %vm1298_vm3, %v225_v42, %v229_v23  ;;  %v252_v52 = vor.u32 %v251_v45, %v248_v44  ;;  %v666_v55 = vshll.u32 %v1037_v41, 16  ;;  %v671_v60 = vshrl.u32 %v1038_v46, 16  ;;  %v1321_v6 = vld [vmem:[%s1265_s24 + $0x28] sm:$0xf]  ;;  %v197_v13 = vld [vmem:[%s1265_s24 + $0x2c] sm:$0x1] }
  0x1e   : > { %v999_v57 = vcombine.low %v216_v47, %v230_v51  ;;  %v239_v58 = vrot.slane %v238_v48, 4  ;;  %v659_v59 = vrot.slane %v657_v50, 4  ;;  %v662_v62 = vrot.slane %v660_v54, 5  ;;  %v1040_v15 = vld [vmem:[%s1265_s24 + $0x18] sm:$0xf] }
  0x1f   : > { %v253_v61 = vrot.slane %v252_v52, 4  ;;  %v668_v63 = vrot.slane %v666_v55, 5  ;;  %v674_v0 = vshll.u32 %v1038_v46, 16  ;;  %v673_v4 = vrot.slane %v671_v60, 4  ;;  %v1041_v26 = vld [vmem:[%s1265_s24 + $0x1c] sm:$0x1] }
  0x20   : > { %1088 = vmatprep.mubr.msk.bf16.mxu1 %vm336_vm0, %v999_v57  ;;  %v244_v3 = vsel %vm1298_vm3, %v239_v58, %v243_v43  ;;  %v680_v5 = vshll.u32 %v1039_v53, 16  ;;  %v260_v9 = vshrl.u32 %v1314_v56, 16  ;;  %v663_v11 = vor.u32 %v662_v62, %v659_v59  ;;  %v1042_v30 = vld [vmem:[%s1265_s24 + $0x20] sm:$0xf]  ;;  %v1043_v39 = vld [vmem:[%s1265_s24 + $0x24] sm:$0x1] }
  0x21   : > { %v258_v10 = vsel %vm1298_vm3, %v253_v61, %v257_v49  ;;  %v676_v12 = vrot.slane %v674_v0, 5  ;;  %v263_v14 = vshll.u32 %v1314_v56, 16  ;;  %v269_v19 = vshll.u32 %v196_v1, 16  ;;  %v1344_v50 = vld [vmem:[%s1265_s24 + $0x38] sm:$0xf] }
  0x22   : > { %v1000_v16 = vcombine.low %v244_v3, %v258_v10  ;;  %v682_v17 = vrot.slane %v680_v5, 5  ;;  %v262_v18 = vrot.slane %v260_v9, 4  ;;  %v664_v20 = vrot.slane %v663_v11, 4  ;;  %v198_v51 = vld [vmem:[%s1265_s24 + $0x34] sm:$0x1] }
  0x23   : > { %v677_v21 = vor.u32 %v676_v12, %v673_v4  ;;  %v265_v22 = vrot.slane %v263_v14, 5  ;;  %v274_v23 = vshrl.u32 %v1321_v6, 16  ;;  %v271_v27 = vrot.slane %v269_v19, 5  ;;  %v199_v62 = vld [vmem:[%s1265_s24 + $0x3c] sm:$0x1] }
  0x24   : > { %1089 = vmatmul.mubr.msk.bf16.vlgmr.msra.gmra.mrb[0].mxu1 %vm336_vm0, %v1000_v16  ;;  %v277_v28 = vshll.u32 %v1321_v6, 16  ;;  %v283_v29 = vshll.u32 %v197_v13, 16  ;;  %v685_v32 = vshrl.u32 %v1040_v15, 16  ;;  %v669_v33 = vsel %vm1298_vm3, %v664_v20, %v668_v63  ;;  %v1044_v10 = vld [vmem:[%s1265_s24 + $0x28] sm:$0xf] }
  0x25   : > { %1097 = vmatpush3.bf16.msra.mxu1 %v1255_v2  ;;  %v678_v34 = vrot.slane %v677_v21, 4  ;;  %v266_v35 = vor.u32 %v265_v22, %v262_v18  ;;  %v276_v36 = vrot.slane %v274_v23, 4  ;;  %v688_v41 = vshll.u32 %v1040_v15, 16  ;;  %v1341_v2 = vld [vmem:[%s1265_s24 + $0x30] sm:$0xf] }
  0x26   : > { %v279_v37 = vrot.slane %v277_v28, 5  ;;  %v285_v38 = vrot.slane %v283_v29, 5  ;;  %v687_v40 = vrot.slane %v685_v32, 4  ;;  %v694_v44 = vshll.u32 %v1041_v26, 16  ;;  %v1045_v11 = vld [vmem:[%s1265_s24 + $0x2c] sm:$0x1] }
  0x27   : > { %v683_v42 = vsel %vm1298_vm3, %v678_v34, %v682_v17  ;;  %v267_v43 = vrot.slane %v266_v35, 4  ;;  %v699_v45 = vshrl.u32 %v1042_v30, 16  ;;  %v690_v48 = vrot.slane %v688_v41, 5  ;;  %v1046_v15 = vld [vmem:[%s1265_s24 + $0x30] sm:$0xf] }
  0x28   : > { %v1054_v46 = vcombine.low %v669_v33, %v683_v42  ;;  %v280_v47 = vor.u32 %v279_v37, %v276_v36  ;;  %v702_v49 = vshll.u32 %v1042_v30, 16  ;;  %v696_v53 = vrot.slane %v694_v44, 5  ;;  %v1047_v22 = vld [vmem:[%s1265_s24 + $0x34] sm:$0x1]  ;;  %v1048_v30 = vld [vmem:[%s1265_s24 + $0x38] sm:$0xf] }
  0x29   : > { %v272_v52 = vsel %vm1298_vm3, %v267_v43, %v271_v27  ;;  %v701_v54 = vrot.slane %v699_v45, 4  ;;  %v708_v55 = vshll.u32 %v1043_v39, 16  ;;  %v691_v58 = vor.u32 %v690_v48, %v687_v40  ;;  %v1049_v36 = vld [vmem:[%s1265_s24 + $0x3c] sm:$0x1]  ;;  %v1050_v41 = vld [vmem:[%s1265_s24 + $0x40] sm:$0xf] }
  0x2a   : > { %1118 = vmatprep.mubr.msk.bf16.mxu0 %vm336_vm0, %v1054_v46  ;;  %v281_v57 = vrot.slane %v280_v47, 4  ;;  %v704_v59 = vrot.slane %v702_v49, 5  ;;  %v288_v60 = vshrl.u32 %v1341_v2, 16  ;;  %v291_v63 = vshll.u32 %v1341_v2, 16 }
  0x2b   : > { %v710_v61 = vrot.slane %v708_v55, 5  ;;  %v297_v0 = vshll.u32 %v198_v51, 16  ;;  %v302_v1 = vshrl.u32 %v1344_v50, 16  ;;  %v692_v4 = vrot.slane %v691_v58, 4 }
  0x2c   : > { %v286_v3 = vsel %vm1298_vm3, %v281_v57, %v285_v38  ;;  %v705_v5 = vor.u32 %v704_v59, %v701_v54  ;;  %v290_v9 = vrot.slane %v288_v60, 4  ;;  %v293_v13 = vrot.slane %v291_v63, 5 }
  0x2d   : > { %v1001_v12 = vcombine.low %v272_v52, %v286_v3  ;;  %v304_v14 = vrot.slane %v302_v1, 4  ;;  %v1008_v16 = vcombine.low %v1273_v7, %v1276_v8  ;;  %v697_v17 = vsel %vm1298_vm3, %v692_v4, %v696_v53  ;;  %v1051_v52 = vld [vmem:[%s1265_s24 + $0x44] sm:$0x1] }
  0x2e   : > { %v706_v18 = vrot.slane %v705_v5, 4  ;;  %v305_v19 = vshll.u32 %v1344_v50, 16  ;;  %v311_v20 = vshll.u32 %v199_v62, 16  ;;  %v294_v21 = vor.u32 %v293_v13, %v290_v9 }
  0x2f   : > { %1092 = vmatprep.mubr.msk.bf16.mxu1 %vm336_vm0, %v1001_v12  ;;  %v713_v23 = vshrl.u32 %v1044_v10, 16  ;;  %v716_v26 = vshll.u32 %v1044_v10, 16  ;;  %v722_v27 = vshll.u32 %v1045_v11, 16  ;;  %v299_v7 = vrot.slane %v297_v0, 5 }
  0x30   : > { %v711_v28 = vsel %vm1298_vm3, %v706_v18, %v710_v61  ;;  %v307_v8 = vrot.slane %v305_v19, 5  ;;  %v727_v29 = vshrl.u32 %v1046_v15, 16  ;;  %v295_v33 = vrot.slane %v294_v21, 4 }
  0x31   : > { %v1055_v32 = vcombine.low %v697_v17, %v711_v28  ;;  %v715_v34 = vrot.slane %v713_v23, 4  ;;  %v718_v35 = vrot.slane %v716_v26, 5  ;;  %v313_v38 = vrot.slane %v311_v20, 5 }
  0x32   : > { %v308_v37 = vor.u32 %v307_v8, %v304_v14  ;;  %v729_v39 = vrot.slane %v727_v29, 4  ;;  %v730_v40 = vshll.u32 %v1046_v15, 16  ;;  %v724_v43 = vrot.slane %v722_v27, 5 }
  0x33   : > { %1119 = vmatmul.mubr.msk.bf16.vlgmr.msra.gmra.mrb[0].mxu0 %vm336_vm0, %v1055_v32  ;;  %v719_v42 = vor.u32 %v718_v35, %v715_v34  ;;  %v736_v44 = vshll.u32 %v1047_v22, 16  ;;  %v741_v45 = vshrl.u32 %v1048_v30, 16  ;;  %v300_v46 = vsel %vm1298_vm3, %v295_v33, %v299_v7 }
  0x34   : > { %v309_v47 = vrot.slane %v308_v37, 4  ;;  %v732_v48 = vrot.slane %v730_v40, 5  ;;  %v744_v49 = vshll.u32 %v1048_v30, 16  ;;  %v750_v54 = vshll.u32 %v1049_v36, 16 }
  0x35   : > { %v720_v51 = vrot.slane %v719_v42, 4  ;;  %v743_v53 = vrot.slane %v741_v45, 4  ;;  %v755_v55 = vshrl.u32 %v1050_v41, 16  ;;  %v738_v59 = vrot.slane %v736_v44, 5 }
  0x36   : > { %v314_v57 = vsel %vm1298_vm3, %v309_v47, %v313_v38  ;;  %v733_v58 = vor.u32 %v732_v48, %v729_v39  ;;  %v746_v60 = vrot.slane %v744_v49, 5  ;;  %v758_v63 = vshll.u32 %v1050_v41, 16 }
  0x37   : > { %v1002_v61 = vcombine.low %v300_v46, %v314_v57  ;;  %v757_v62 = vrot.slane %v755_v55, 4  ;;  %v725_v0 = vsel %vm1298_vm3, %v720_v51, %v724_v43  ;;  %v764_v4 = vshll.u32 %v1051_v52, 16 }
  0x38   : > { %v734_v1 = vrot.slane %v733_v58, 4  ;;  %v747_v3 = vor.u32 %v746_v60, %v743_v53  ;;  %v752_v5 = vrot.slane %v750_v54, 5  ;;  %v760_v9 = vrot.slane %v758_v63, 5 }
  0x39   : > { %1093 = vmatmul.mubr.msk.bf16.gmra.mrb[4].mxu1 %vm336_vm0, %v1002_v61  ;;  %v766_v14 = vrot.slane %v764_v4, 5  ;;  %v1009_v18 = vcombine.low %v1287_v24, %v1290_v25  ;;  %v1010_v19 = vcombine.low %v1314_v56, %v1321_v6  ;;  %v1011_v21 = vcombine.low %v1341_v2, %v1344_v50 }
  0x3a   : > { %v739_v10 = vsel %vm1298_vm3, %v734_v1, %v738_v59  ;;  %1098 = vmatprep.mubr.msk.bf16.mxu1 %vm336_vm0, %v1008_v16  ;;  %v748_v11 = vrot.slane %v747_v3, 4  ;;  %v761_v13 = vor.u32 %v760_v9, %v757_v62 }
  0x3b   : > { %v1056_v12 = vcombine.low %v725_v0, %v739_v10 }
  0x3c   : > { %v753_v15 = vsel %vm1298_vm3, %v748_v11, %v752_v5  ;;  %v762_v17 = vrot.slane %v761_v13, 4 }
  0x3d   : > { %1122 = vmatprep.mubr.msk.bf16.mxu0 %vm336_vm0, %v1056_v12 }
  0x3e   : > { %v767_v16 = vsel %vm1298_vm3, %v762_v17, %v766_v14 }
  0x3f   : > { %v1057_v20 = vcombine.low %v753_v15, %v767_v16 }
  0x41   : > { %1099 = vmatmul.mubr.msk.bf16.vlgmr.msra.gmra.mrb[0].mxu1 %vm336_vm0, %v1009_v18  ;;  %1123 = vmatmul.mubr.msk.bf16.gmra.mrb[4].mxu0 %vm336_vm0, %v1057_v20 }
  0x42   : > { %1102 = vmatprep.mubr.msk.bf16.mxu1 %vm336_vm0, %v1010_v19 }
  0x49   : > { %1103 = vmatmul.mubr.msk.bf16.gmra.mrb[4].mxu1 %vm336_vm0, %v1011_v21 }
 0x106   : > { %v1120_v22 = vpop.f32.mrb[0].mxu0 }
 0x107   : > { %v835_v24 = vpop.f32.mrb[1].mxu0 }
 0x108   : > { %v1121_v25 = vpop.f32.mrb[2].mxu0 }
 0x109   : > { %v838_v23 = vpop.f32.mrb[3].mxu0 }
 0x114   : > { %v1100_v56 = vpop.f32.mrb[0].mxu1  ;;  %v1124_v6 = vpop.f32.mrb[4].mxu0 }
 0x115   : > { %v1126_v31 = vadd.f32 %v1120_v22, %v1100_v56  ;;  %v486_v26 = vpop.f32.mrb[1].mxu1  ;;  %v851_v27 = vpop.f32.mrb[5].mxu0 }
 0x116   : > { %v1127_v28 = vadd.f32 %v835_v24, %v486_v26  ;;  %v1101_v7 = vpop.f32.mrb[2].mxu1  ;;  %v1125_v29 = vpop.f32.mrb[6].mxu0 }
 0x117   : > { %v876_v8 = vmax.f32 %v1126_v31, 0.0  ;;  %v1128_v30 = vadd.f32 %v1121_v25, %v1101_v7  ;;  %v489_v32 = vpop.f32.mrb[3].mxu1  ;;  %v854_v50 = vpop.f32.mrb[7].mxu0 }
 0x118   : > { %v874_v2 = vmax.f32 %v1127_v28, 0.0  ;;  %v1129_v33 = vadd.f32 %v838_v23, %v489_v32 }
 0x119   : > { %v884_v34 = vpack.c.bf16 %v876_v8, %v876_v8  ;;  %v877_v35 = vmax.f32 %v1128_v30, 0.0 }
 0x11a   : > { %v882_v36 = vpack.c.bf16 %v874_v2, %v874_v2  ;;  %v875_v37 = vmax.f32 %v1129_v33, 0.0 }
 0x11b   : > { %893 = vst.msk [vmem:[%s1402_s28 + $0x8] sm:$0xf] %vm890_vm4, %v884_v34  ;;  %v885_v38 = vpack.c.bf16 %v877_v35, %v877_v35 }
 0x11c   : > { %891 = vst.msk [vmem:[%s1402_s28] sm:$0xf] %vm890_vm4, %v882_v36  ;;  %v883_v39 = vpack.c.bf16 %v875_v37, %v875_v37  ;;  %v1104_v40 = vpop.f32.mrb[4].mxu1 }
 0x11d   : > { %894 = vst.msk [vmem:[%s1402_s28 + $0xc] sm:$0xf] %vm890_vm4, %v885_v38  ;;  %v1130_v41 = vadd.f32 %v1124_v6, %v1104_v40  ;;  %v502_v42 = vpop.f32.mrb[5].mxu1 }
 0x11e   : > { %892 = vst.msk [vmem:[%s1402_s28 + $0x4] sm:$0xf] %vm890_vm4, %v883_v39  ;;  %v1131_v43 = vadd.f32 %v851_v27, %v502_v42  ;;  %v1105_v44 = vpop.f32.mrb[6].mxu1 }
 0x11f   : > { %v880_v45 = vmax.f32 %v1130_v41, 0.0  ;;  %v1132_v46 = vadd.f32 %v1125_v29, %v1105_v44  ;;  %v505_v47 = vpop.f32.mrb[7].mxu1 }
 0x120   : > { %v878_v48 = vmax.f32 %v1131_v43, 0.0  ;;  %v1133_v49 = vadd.f32 %v854_v50, %v505_v47 }
 0x121   : > { %v888_v51 = vpack.c.bf16 %v880_v45, %v880_v45  ;;  %v881_v52 = vmax.f32 %v1132_v46, 0.0 }
 0x122   : > { %v886_v53 = vpack.c.bf16 %v878_v48, %v878_v48  ;;  %v879_v54 = vmax.f32 %v1133_v49, 0.0 }
 0x123   : > { %897 = vst.msk [vmem:[%s1402_s28 + $0x18] sm:$0xf] %vm890_vm4, %v888_v51  ;;  %v889_v55 = vpack.c.bf16 %v881_v52, %v881_v52 }
 0x124   : > { %895 = vst.msk [vmem:[%s1402_s28 + $0x10] sm:$0xf] %vm890_vm4, %v886_v53  ;;  %v887_v57 = vpack.c.bf16 %v879_v54, %v879_v54 }
 0x125   : > { %898 = vst.msk [vmem:[%s1402_s28 + $0x1c] sm:$0xf] %vm890_vm4, %v889_v55 }
 0x126   : > { %896 = vst.msk [vmem:[%s1402_s28 + $0x14] sm:$0xf] %vm890_vm4, %v887_v57 }
 0x127 PF: > { %s12_s11 = sadd.s32 1, %s1209_s11   ;;  %s1434_s9 = smov %s1205_s10 }
 0x128   : > { %p9_p5 = scmp.ge.s32.totalorder %s12_s11, 4   ;;  %s1435_s10 = smov %s1437_s12 }
 0x12a   :  { %11 = sbr.rel (!%p9_p5) target bundleno = 2 (0x2), region = 62 }

// kernel: a_call__.3
= control target key start
LH: loop header
LB: loop body
LE: loop exit
PB: predicated region body
PF: predicated region fallthrough
CT: control target
= control target key end

     0   :  { %s4249_s18 = smov 0   ;;  %s4251_s19 = smov 0   ;;  %s5256_s0 = inlined_call_operand.vmem [shape: bf16[2,1,10,10,8], index: 0, kind: input, shape index: {}]   ;;  %s5257_s1 = inlined_call_operand.vmem [shape: bf16[2,8,8,16], index: 1, kind: input, shape index: {}]   ;;  %s5258_s2 = inlined_call_operand.vmem [shape: bf16[4,4,8,4], index: 2, kind: input, shape index: {}]   ;;  %s5259_s3 = inlined_call_operand.vmem [shape: bf16[4,4], index: 3, kind: input, shape index: {}]   ;;  %s5260_s4 = inlined_call_operand.vmem [shape: bf16[2,8,8,32], index: 4, kind: output, shape index: {0}]   ;;  %s5261_s5 = inlined_call_operand.vmem [shape: f32[2,1,1,8], index: 5, kind: output, shape index: {1}]  }
   0x1   :  { %s4253_s20 = smov 0  }
   0x2 LB: > { %s28_s21 = sadd.s32 1, %s4203_s19  ;;  %p3345_p0 = scmp.ge.s32.totalorder %s4207_s20, 1  ;;  %s4207_s20 = sphi %s4253_s20, %s16_s20   ;;  %s4203_s19 = sphi %s4251_s19, %s5267_s19   ;;  %s4199_s18 = sphi %s4249_s18, %s5266_s18  }
   0x3   : > { %p30_p1 = scmp.ge.s32.totalorder %s28_s21, 2  ;;  %p229_p2 = scmp.lt.s32.totalorder %s4207_s20, 3 }
   0x5   : > { %s5269_s21 = smov (%p30_p1, %s28_s21), 0  ;;  %p230_p3 = pnand %p3345_p0, %p229_p2 }
   0x6   : > { %v4270_v0 = vld [vmem:[%s5259_s3] sm:$0x3] (!%p230_p3)  ;;  %vm358_vm0 = vcmask (!%p230_p3), 1041408   ;;  %p280_p4 = scmp.lt.s32.totalorder (!%p230_p3), %s4199_s18, 1  ;;  %v3359_v2 = vld [vmem:[%s5258_s2 + $0x4] sm:$0xf] (!%p230_p3) }
   0x7   : > { %233 = sbr.rel (%p230_p3) target bundleno = 644 (0x284), region = 36  ;;  %3974 = vmatprep.subr.msk.bf16.mxu1 (!%p230_p3), %vm358_vm0, %v4270_v0  ;;  %v4276_v1 = vsel (!%p230_p3), %vm358_vm0, %v4270_v0, 0  ;;  %vm586_vm1 = vcmask (!%p230_p3), 1043456   ;;  %3979 = vmatprep.subr.msk.bf16.mxu0 (!%p230_p3), %vm358_vm0, %v4270_v0  ;;  %vm345_vm2 = vcmask (!%p230_p3), 31744   ;;  %vm444_vm3 = vsmask.f32 (!%p230_p3), 3328 }
   0x8   : > { %3679 = vmatpush3.bf16.msra.mxu1 (!%p230_p3), %v4276_v1  ;;  %3729 = vmatpush3.bf16.msra.mxu0 (!%p230_p3), %v4276_v1  ;;  %vm445_vm4 = vsmask.f32 (!%p230_p3), 7440  ;;  %v435_v3 = vld [vmem:[%s5258_s2] sm:$0xf] (!%p230_p3)  ;;  %v4301_v4 = vld [vmem:[%s5258_s2 + $0x14] sm:$0xf] (!%p230_p3) }
   0x9   : > { %3975 = vmatprep.subr.msk.bf16.mxu1 (!%p230_p3), %vm586_vm1, %v3359_v2  ;;  %3980 = vmatprep.subr.msk.bf16.mxu0 (!%p230_p3), %vm586_vm1, %v4301_v4  ;;  %s4209_s13 = smov (!%p230_p3), 124   ;;  %v588_v8 = vsel (!%p230_p3), %vm586_vm1, %v3359_v2, 0  ;;  %v4324_v10 = vsel (!%p230_p3), %vm586_vm1, %v435_v3, 0  ;;  %vm573_vm5 = vcmask (!%p230_p3), 64512   ;;  %s4210_s14 = smov (!%p230_p3), 120   ;;  %vm4375_vm6 = vmor (!%p230_p3), %vm444_vm3, %vm445_vm4  ;;  %vm1265_vm7 = vcmask (!%p230_p3), 1042432  }
   0xa   : > { %s4211_s15 = smov (!%p230_p3), 116   ;;  %vm1266_vm8 = vcmask (!%p230_p3), 1046532   ;;  %s4213_s28 = smov (!%p230_p3), 8   ;;  %vm3129_vm10 = vcmask (!%p230_p3), 97280   ;;  %vm3138_vm11 = vcmask (!%p230_p3), 130048   ;;  %vm3147_vm12 = vcmask (!%p230_p3), 162816  }
   0xb   : > { %vm4543_vm9 = vmor (!%p230_p3), %vm1265_vm7, %vm1266_vm8  ;;  %s4214_s29 = smov (!%p230_p3), 16   ;;  %s4216_s6 = smov (!%p230_p3), 20   ;;  %vm3156_vm13 = vcmask (!%p230_p3), 195584   ;;  %vm3165_vm14 = vcmask (!%p230_p3), 228352   ;;  %vm3182_vm15 = vcmask (!%p230_p3), 257024  }
   0xc   : > { %s4217_s7 = smov (!%p230_p3), 24   ;;  %s4218_s8 = smov (!%p230_p3), 28  }
   0xe   : > { %s5271_s18 = smov (!%p280_p4, %s4199_s18), 1 }
   0xf   : > { %s3576_s26 = sshll.u32 %s5271_s18, 5  ;;  %s3994_s27 = smul.u32 80, %s5271_s18 }
  0x10   : > { %s297_s30 = scalar_lea.vmem %s5257_s1, %s3576_s26  ;;  %s5189_s11 = scalar_lea.vmem %s5260_s4, %s3576_s26 }
  0x11   : > { %v4303_v5 = vld [vmem:[%s297_s30] sm:$0xff]   ;;  %s4310_s12 = scalar_lea.vmem %s5256_s0, %s3994_s27  ;;  %v4312_v6 = vld [vmem:[%s297_s30 + $0x10] sm:$0xff]   ;;  %v4317_v7 = vld [vmem:[%s297_s30 + $0x8] sm:$0xff]  }
  0x12   : > { %1154 = vrot.lane.b32.xlu0 %v4303_v5, %s4209_s13  ;;  %3680 = vmatprep.mubr.msk.bf16.mxu1 %vm345_vm2, %v4303_v5  ;;  %v4321_v9 = vld [vmem:[%s297_s30 + $0x18] sm:$0xff]   ;;  %v4329_v11 = vld [vmem:[%s4310_s12] sm:$0xf]  ;;  %v4332_v12 = vld [vmem:[%s4310_s12 + $0x8] sm:$0xf]  ;;  %s4215_s30 = smov 12  }
  0x13   : > { %1158 = vrot.lane.b32.xlu1 %v4312_v6, %s4209_s13  ;;  %3681 = vmatmul.mubr.msk.bf16.vlgmr.msra.gmra.mrb[0].mxu1 %vm345_vm2, %v4317_v7  ;;  %v4335_v13 = vld [vmem:[%s4310_s12 + $0x4] sm:$0x1]  ;;  %v4340_v14 = vld [vmem:[%s4310_s12 + $0xc] sm:$0x1]  ;;  %v448_v15 = vshrl.u32 %v4329_v11, 16  ;;  %v451_v16 = vshll.u32 %v4329_v11, 16 }
  0x14   : > { %3684 = vmatprep.mubr.msk.bf16.mxu1 %vm345_vm2, %v4312_v6  ;;  %3689 = vmatpush3.bf16.msra.mxu1 %v588_v8  ;;  %v457_v17 = vshll.u32 %v4335_v13, 16  ;;  %v462_v18 = vshrl.u32 %v4332_v12, 16  ;;  %v465_v19 = vshll.u32 %v4332_v12, 16  ;;  %v471_v20 = vshll.u32 %v4340_v14, 16  ;;  %v4350_v21 = vld [vmem:[%s4310_s12 + $0x10] sm:$0xf] }
  0x15   : > { %v4353_v22 = vld [vmem:[%s4310_s12 + $0x18] sm:$0xf]  ;;  %3976 = vmatprep.subr.msk.bf16.mxu1 %vm586_vm1, %v435_v3  ;;  %v450_v23 = vrot.slane %v448_v15, 4  ;;  %v453_v24 = vrot.slane %v451_v16, 5  ;;  %v4358_v27 = vld [vmem:[%s4310_s12 + $0x14] sm:$0x1] }
  0x16   : > { %1156 = vrot.lane.b32.xlu0 %v4317_v7, %s4209_s13  ;;  %v459_v25 = vrot.slane %v457_v17, 5  ;;  %v464_v26 = vrot.slane %v462_v18, 4  ;;  %v467_v28 = vrot.slane %v465_v19, 5  ;;  %v473_v29 = vrot.slane %v471_v20, 5  ;;  %v4361_v30 = vld [vmem:[%s4310_s12 + $0x1c] sm:$0x1] }
  0x17   : > { %1160 = vrot.lane.b32.xlu1 %v4321_v9, %s4209_s13  ;;  %v476_v31 = vshrl.u32 %v4350_v21, 16  ;;  %v479_v32 = vshll.u32 %v4350_v21, 16  ;;  %v454_v33 = vor.u32 %v453_v24, %v450_v23  ;;  %v485_v34 = vshll.u32 %v4358_v27, 16  ;;  %v4369_v37 = vld [vmem:[%s4310_s12 + $0x20] sm:$0xf] }
  0x18   : > { %v490_v35 = vshrl.u32 %v4353_v22, 16  ;;  %v493_v36 = vshll.u32 %v4353_v22, 16  ;;  %v468_v39 = vor.u32 %v467_v28, %v464_v26  ;;  %v499_v42 = vshll.u32 %v4361_v30, 16  ;;  %v4381_v43 = vld [vmem:[%s4310_s12 + $0x28] sm:$0xf] }
  0x19   : > { %v478_v40 = vrot.slane %v476_v31, 4  ;;  %v481_v41 = vrot.slane %v479_v32, 5  ;;  %v455_v44 = vrot.slane %v454_v33, 4  ;;  %v487_v45 = vrot.slane %v485_v34, 5  ;;  %v4386_v48 = vld [vmem:[%s4310_s12 + $0x24] sm:$0x1] }
  0x1a   : > { %1750 = vrot.lane.b32.xlu0 %v4303_v5, %s4210_s14  ;;  %v492_v46 = vrot.slane %v490_v35, 4  ;;  %v495_v47 = vrot.slane %v493_v36, 5  ;;  %v469_v49 = vrot.slane %v468_v39, 4  ;;  %v501_v51 = vrot.slane %v499_v42, 5  ;;  %v4394_v55 = vld [vmem:[%s4310_s12 + $0x2c] sm:$0x1] }
  0x1b   : > { %1752 = vrot.lane.b32.xlu1 %v4317_v7, %s4210_s14  ;;  %3685 = vmatmul.mubr.msk.bf16.gmra.mrb[4].mxu1 %vm345_vm2, %v4321_v9  ;;  %v482_v50 = vor.u32 %v481_v41, %v478_v40  ;;  %v504_v52 = vshrl.u32 %v4369_v37, 16  ;;  %v460_v53 = vsel %vm4375_vm6, %v455_v44, %v459_v25  ;;  %v507_v56 = vshll.u32 %v4369_v37, 16  ;;  %v4404_v62 = vld [vmem:[%s4310_s12 + $0x30] sm:$0xf]  ;;  %v4411_v8 = vld [vmem:[%s4310_s12 + $0x38] sm:$0xf] }
  0x1c   : > { %v496_v54 = vor.u32 %v495_v47, %v492_v46  ;;  %v513_v57 = vshll.u32 %v4386_v48, 16  ;;  %v474_v58 = vsel %vm4375_vm6, %v469_v49, %v473_v29  ;;  %v518_v61 = vshrl.u32 %v4381_v43, 16  ;;  %v4425_v20 = vld [vmem:[%s4310_s12 + $0x3c] sm:$0x1]  ;;  %v4432_v25 = vld [vmem:[%s5258_s2 + $0x8] sm:$0xf] }
  0x1d   : > { %v483_v59 = vrot.slane %v482_v50, 4  ;;  %v506_v60 = vrot.slane %v504_v52, 4  ;;  %v4408_v63 = vcombine.low %v460_v53, %v474_v58  ;;  %v509_v3 = vrot.slane %v507_v56, 5  ;;  %v3393_v53 = vld [vmem:[%s4310_s12 + $0x8] sm:$0xf] }
  0x1e   : > { %2376 = vrot.lane.b32.xlu0 %v4303_v5, %s4211_s15  ;;  %v497_v2 = vrot.slane %v496_v54, 4  ;;  %v4414_v5 = vld [vmem:[%s4310_s12 + $0x34] sm:$0x1]  ;;  %v520_v16 = vrot.slane %v518_v61, 4  ;;  %v521_v17 = vshll.u32 %v4381_v43, 16  ;;  %v527_v18 = vshll.u32 %v4394_v55, 16 }
  0x1f   : > { %2378 = vrot.lane.b32.xlu1 %v4317_v7, %s4211_s15  ;;  %v488_v15 = vsel %vm4375_vm6, %v483_v59, %v487_v45  ;;  %3690 = vmatprep.mubr.msk.bf16.mxu1 %vm573_vm5, %v4408_v63  ;;  %v510_v19 = vor.u32 %v509_v3, %v506_v60  ;;  %v532_v23 = vshrl.u32 %v4404_v62, 16  ;;  %v535_v24 = vshll.u32 %v4404_v62, 16  ;;  %v3395_v56 = vld [vmem:[%s4310_s12 + $0x10] sm:$0xf] }
  0x20   : > { %v502_v7 = vsel %vm4375_vm6, %v497_v2, %v501_v51  ;;  %v515_v28 = vrot.slane %v513_v57, 5  ;;  %v523_v29 = vrot.slane %v521_v17, 5  ;;  %v541_v31 = vshll.u32 %v4414_v5, 16  ;;  %v4474_v17 = vld [vmem:[%s4310_s12 + $0xc] sm:$0x1] }
  0x21   : > { %v4436_v26 = vcombine.low %v488_v15, %v502_v7  ;;  %v511_v32 = vrot.slane %v510_v19, 4  ;;  %v534_v33 = vrot.slane %v532_v23, 4  ;;  %v537_v34 = vrot.slane %v535_v24, 5  ;;  %v3397_v7 = vld [vmem:[%s4310_s12 + $0x18] sm:$0xf] }
  0x22   : > { %1754 = vrot.lane.b32.xlu0 %v4312_v6, %s4210_s14  ;;  %v546_v35 = vshrl.u32 %v4411_v8, 16  ;;  %v524_v36 = vor.u32 %v523_v29, %v520_v16  ;;  %v529_v39 = vrot.slane %v527_v18, 5  ;;  %v549_v40 = vshll.u32 %v4411_v8, 16  ;;  %v4478_v18 = vld [vmem:[%s4310_s12 + $0x14] sm:$0x1] }
  0x23   : > { %1756 = vrot.lane.b32.xlu1 %v4321_v9, %s4210_s14  ;;  %3691 = vmatmul.mubr.msk.bf16.vlgmr.msra.gmra.mrb[8].mxu1 %vm573_vm5, %v4436_v26  ;;  %v555_v41 = vshll.u32 %v4425_v20, 16  ;;  %v538_v42 = vor.u32 %v537_v34, %v534_v33  ;;  %v516_v45 = vsel %vm4375_vm6, %v511_v32, %v515_v28  ;;  %v543_v47 = vrot.slane %v541_v31, 5  ;;  %v3409_v19 = vld [vmem:[%s5258_s2 + $0xc] sm:$0xf]  ;;  %v4486_v28 = vld [vmem:[%s4310_s12 + $0x1c] sm:$0x1]  ;;  %s314_s14 = scalar_lea.vmem %s5261_s5, %s5271_s18 }
  0x24   : > { %v548_v44 = vrot.slane %v546_v35, 4  ;;  %3699 = vmatpush3.bf16.msra.mxu1 %v4324_v10  ;;  %v525_v46 = vrot.slane %v524_v36, 4  ;;  %v551_v49 = vrot.slane %v549_v40, 5  ;;  %v894_v59 = vshll.u32 %v3393_v53, 16  ;;  %v3399_v32 = vld [vmem:[%s4310_s12 + $0x20] sm:$0xf] }
  0x25   : > { %3977 = vmatprep.subr.msk.bf16.mxu1 %vm586_vm1, %v4432_v25  ;;  %v539_v50 = vrot.slane %v538_v42, 4  ;;  %v557_v52 = vrot.slane %v555_v41, 5  ;;  %v3368_v60 = vcombine.low %v4329_v11, %v4332_v12  ;;  %v905_v61 = vshrl.u32 %v3395_v56, 16  ;;  %v4495_v35 = vld [vmem:[%s4310_s12 + $0x24] sm:$0x1] }
  0x26   : > { %2380 = vrot.lane.b32.xlu0 %v4312_v6, %s4211_s15  ;;  %v530_v51 = vsel %vm4375_vm6, %v525_v46, %v529_v39  ;;  %v552_v10 = vor.u32 %v551_v49, %v548_v44  ;;  %v891_v6 = vshrl.u32 %v3393_v53, 16  ;;  %v908_v2 = vshll.u32 %v3395_v56, 16  ;;  %v3401_v39 = vld [vmem:[%s4310_s12 + $0x28] sm:$0xf]  ;;  %v3403_v56 = vld [vmem:[%s4310_s12 + $0x30] sm:$0xf] }
  0x27   : > { %2382 = vrot.lane.b32.xlu1 %v4321_v9, %s4211_s15  ;;  %v4458_v54 = vcombine.low %v516_v45, %v530_v51  ;;  %v544_v57 = vsel %vm4375_vm6, %v539_v50, %v543_v47  ;;  %v896_v16 = vrot.slane %v894_v59, 5  ;;  %v907_v11 = vrot.slane %v905_v61, 4  ;;  %v4512_v50 = vld [vmem:[%s4310_s12 + $0x2c] sm:$0x1]  ;;  %v1241_v51 = vld [vmem:[%s4310_s12] sm:$0xe] }
  0x28   : > { %v553_v58 = vrot.slane %v552_v10, 4  ;;  %v893_v15 = vrot.slane %v891_v6, 4  ;;  %v910_v12 = vrot.slane %v908_v2, 5  ;;  %v900_v24 = vshll.u32 %v4474_v17, 16 }
  0x29   : > { %3694 = vmatprep.mubr.msk.bf16.mxu1 %vm573_vm5, %v4458_v54  ;;  %v3369_v29 = vcombine.low %v4350_v21, %v4353_v22  ;;  %v914_v31 = vshll.u32 %v4478_v18, 16  ;;  %v3370_v33 = vcombine.low %v4369_v37, %v4381_v43  ;;  %v919_v36 = vshrl.u32 %v3397_v7, 16 }
  0x2a   : > { %v558_v9 = vsel %vm4375_vm6, %v553_v58, %v557_v52  ;;  %v897_v23 = vor.u32 %v896_v16, %v893_v15  ;;  %v911_v34 = vor.u32 %v910_v12, %v907_v11  ;;  %v799_v40 = vsel %vm586_vm1, %v4432_v25, 0  ;;  %v4525_v58 = vld [vmem:[%s4310_s12 + $0x8] ss:$8 sps:$4 sm:$0xff]   ;;  %v1244_v11 = vld [vmem:[%s4310_s12 + $0x18] sm:$0xe] }
  0x2b   : > { %v4469_v3 = vcombine.low %v544_v57, %v558_v9  ;;  %v4501_v41 = vsel %vm586_vm1, %v3409_v19, 0  ;;  %v922_v42 = vshll.u32 %v3397_v7, 16  ;;  %v928_v21 = vshll.u32 %v4486_v28, 16  ;;  %v1242_v57 = vld [vmem:[%s4310_s12 + $0x8] sm:$0xe] }
  0x2c   : > { %v4504_v22 = vrot.slane %v897_v23, 4  ;;  %v902_v44 = vrot.slane %v900_v24, 5  ;;  %v933_v37 = vshrl.u32 %v3399_v32, 16  ;;  %v936_v43 = vshll.u32 %v3399_v32, 16  ;;  %v1245_v24 = vld [vmem:[%s4310_s12 + $0x20] sm:$0xe] }
  0x2d   : > { %3695 = vmatmul.mubr.msk.bf16.gmra.mrb[12].mxu1 %vm573_vm5, %v4469_v3  ;;  %v916_v45 = vrot.slane %v914_v31, 5  ;;  %v942_v25 = vshll.u32 %v4495_v35, 16  ;;  %v947_v46 = vshrl.u32 %v3401_v39, 16  ;;  %v912_v47 = vrot.slane %v911_v34, 4  ;;  %v1246_v34 = vld [vmem:[%s4310_s12 + $0x28] sm:$0xe] }
  0x2e   : > { %3700 = vmatprep.mubr.msk.bf16.mxu1 %vm573_vm5, %v3368_v60  ;;  %v4509_v49 = vrot.slane %v919_v36, 4  ;;  %v3371_v10 = vcombine.low %v4404_v62, %v4411_v8  ;;  %v4518_v52 = vrot.slane %v922_v42, 5  ;;  %v4520_v53 = vrot.slane %v928_v21, 5  ;;  %v1243_v62 = vld [vmem:[%s4310_s12 + $0x10] sm:$0xe] }
  0x2f   : > { %v903_v6 = vsel %vm4375_vm6, %v4504_v22, %v902_v44  ;;  %v4530_v59 = vrot.slane %v933_v37, 4  ;;  %v4532_v9 = vrot.slane %v936_v43, 5  ;;  %v4535_v8 = vrot.slane %v942_v25, 5  ;;  %v4538_v60 = vld [vmem:[%s4310_s12 + $0x34] sm:$0x1] }
  0x30   : > { %v4540_v61 = vrot.slane %v947_v46, 4  ;;  %v950_v2 = vshll.u32 %v3401_v39, 16  ;;  %v3423_v16 = vrot.slane %v1241_v51, 9  ;;  %v917_v12 = vsel %vm4375_vm6, %v912_v47, %v916_v45  ;;  %v4567_v21 = vld [vmem:[%s4310_s12 + $0x38] sm:$0xf] }
  0x31   : > { %v956_v7 = vshll.u32 %v4512_v50, 16  ;;  %v3424_v23 = vrot.slane %v1242_v57, 9  ;;  %v1274_v31 = vrot.slane %v4340_v14, 5  ;;  %v3425_v32 = vrot.slane %v1243_v62, 9  ;;  %v1247_v44 = vld [vmem:[%s4310_s12 + $0x30] sm:$0xe] }
  0x32   : > { %v925_v36 = vor.u32 %v4518_v52, %v4509_v49  ;;  %v4564_v42 = vrot.slane %v950_v2, 5  ;;  %v964_v14 = vshll.u32 %v3403_v56, 16  ;;  %v3427_v45 = vrot.slane %v1245_v24, 9  ;;  %v1248_v25 = vld [vmem:[%s4310_s12 + $0x38] sm:$0xe] }
  0x33   : > { %v4589_v46 = vld [vmem:[%s4310_s12 + $0x18] ss:$8 sps:$4 sm:$0xff]   ;;  %v4591_v47 = vcombine.low %v903_v6, %v917_v12  ;;  %v1286_v51 = vrot.slane %v4386_v48, 5  ;;  %v1290_v57 = vrot.slane %v4394_v55, 5  ;;  %v3429_v62 = vrot.slane %v1247_v44, 9 }
  0x34   : > { %v1294_v2 = vrot.slane %v4414_v5, 5  ;;  %v1298_v12 = vrot.slane %v4425_v20, 5  ;;  %v975_v48 = vshrl.u32 %v4567_v21, 16 }
  0x35   : > { %3701 = vmatmul.mubr.msk.bf16.vlgmr.msra.gmra.mrb[8].mxu1 %vm573_vm5, %v3369_v29  ;;  %v961_v29 = vshrl.u32 %v3403_v56, 16  ;;  %v3407_v56 = vld [vmem:[%s4310_s12 + $0x40] sm:$0xf]  ;;  %v4601_v6 = vsel %vm4543_vm9, %v3427_v45, %v1286_v51 }
  0x36   : > { %3704 = vmatprep.mubr.msk.bf16.mxu1 %vm573_vm5, %v3370_v33  ;;  %3709 = vmatpush3.bf16.msra.mxu1 %v799_v40  ;;  %v1278_v33 = vrot.slane %v4358_v27, 5  ;;  %v1282_v40 = vrot.slane %v4361_v30, 5  ;;  %v4571_v27 = vsel %vm4543_vm9, %v3424_v23, %v1274_v31  ;;  %v970_v30 = vshll.u32 %v4538_v60, 16 }
  0x37   : > { %3978 = vmatprep.subr.msk.bf16.mxu1 %vm586_vm1, %v3409_v19  ;;  %v1270_v19 = vrot.slane %v4335_v13, 5  ;;  %v3426_v13 = vrot.slane %v1244_v11, 9  ;;  %v963_v52 = vrot.slane %v961_v29, 4  ;;  %v3430_v11 = vrot.slane %v1248_v25, 9 }
  0x38   : > { %v4575_v22 = vsel %vm4543_vm9, %v3425_v32, %v1278_v33  ;;  %v978_v23 = vshll.u32 %v4567_v21, 16  ;;  %v4615_v5 = vsel %vm4543_vm9, %v3429_v62, %v1294_v2  ;;  %v989_v24 = vshrl.u32 %v3407_v56, 16 }
  0x39   : > { %v4560_v39 = vsel %vm4543_vm9, %v3423_v16, %v1270_v19  ;;  %v4585_v43 = vsel %vm4543_vm9, %v3426_v13, %v1282_v40  ;;  %v966_v16 = vrot.slane %v964_v14, 5  ;;  %v4605_v19 = vld [vmem:[%s4310_s12 + $0x28] ss:$8 sps:$4 sm:$0xff]   ;;  %v992_v29 = vshll.u32 %v3407_v56, 16  ;;  %v4651_v56 = vld [vmem:[%s4310_s12 + $0x38] ss:$8 sps:$4 sm:$0xff]  }
  0x3a   : > { %v3432_v37 = vcombine.low %v4560_v39, %v4571_v27  ;;  %v3433_v49 = vcombine.low %v4575_v22, %v4585_v43  ;;  %v4621_v31 = vsel %vm4543_vm9, %v3430_v11, %v1298_v12  ;;  %v939_v32 = vor.u32 %v4532_v9, %v4530_v59  ;;  %v3450_v13 = vld [vmem:[%s4310_s12 + $0x10] sm:$0xe]  ;;  %v3451_v59 = vld [vmem:[%s4310_s12 + $0x18] sm:$0xe]  ;;  %v3452_v9 = vld [vmem:[%s4310_s12 + $0x20] sm:$0xe] }
  0x3b   : > { %v3435_v33 = vcombine.low %v4615_v5, %v4621_v31  ;;  %v1566_v40 = vrot.slane %v4474_v17, 5  ;;  %v1570_v14 = vrot.slane %v4478_v18, 5  ;;  %v953_v21 = vor.u32 %v4564_v42, %v4540_v61  ;;  %v4754_v39 = vld [vmem:[%s4310_s12 + $0x44] sm:$0x1]  ;;  %v4761_v27 = vld [vmem:[%s4310_s12 + $0x4c] sm:$0x1] }
  0x3c   : > { %v967_v44 = vor.u32 %v966_v16, %v963_v52  ;;  %v3458_v25 = vrot.slane %v3450_v13, 9  ;;  %v3459_v17 = vrot.slane %v3451_v59, 9  ;;  %v1574_v18 = vrot.slane %v4486_v28, 5  ;;  %v3408_v16 = vld [vmem:[%s4310_s12 + $0x44] sm:$0x1] }
  0x3d   : > { %3705 = vmatmul.mubr.msk.bf16.gmra.mrb[12].mxu1 %vm573_vm5, %v3371_v10  ;;  %v3428_v10 = vrot.slane %v1246_v34, 9  ;;  %v3449_v34 = vld [vmem:[%s4310_s12 + $0x8] sm:$0xe]  ;;  %v3460_v51 = vrot.slane %v3452_v9, 9  ;;  %v926_v61 = vrot.slane %v925_v36, 4  ;;  %v958_v42 = vrot.slane %v956_v7, 5 }
  0x3e   : > { %3710 = vmatprep.mubr.msk.bf16.mxu1 %vm573_vm5, %v4525_v58  ;;  %v3457_v45 = vrot.slane %v3449_v34, 9  ;;  %v940_v28 = vrot.slane %v939_v32, 4  ;;  %v954_v36 = vrot.slane %v953_v21, 4  ;;  %v972_v2 = vrot.slane %v970_v30, 5  ;;  %v3454_v21 = vld [vmem:[%s4310_s12 + $0x30] sm:$0xe] }
  0x3f   : > { %v4611_v55 = vsel %vm4543_vm9, %v3428_v10, %v1290_v57  ;;  %v1578_v10 = vrot.slane %v4495_v35, 5  ;;  %v3406_v57 = vld [vmem:[%s4310_s12 + $0x3c] sm:$0x1]  ;;  %v1575_v35 = vsel %vm4543_vm9, %v3459_v17, %v1574_v18  ;;  %v977_v11 = vrot.slane %v975_v48, 4  ;;  %v3455_v59 = vld [vmem:[%s4310_s12 + $0x38] sm:$0xe] }
  0x40   : > { %v3434_v20 = vcombine.low %v4601_v6, %v4611_v55  ;;  %v1567_v52 = vsel %vm4543_vm9, %v3457_v45, %v1566_v40  ;;  %v968_v34 = vrot.slane %v967_v44, 4  ;;  %v980_v32 = vrot.slane %v978_v23, 5  ;;  %v3456_v17 = vld [vmem:[%s4310_s12 + $0x40] sm:$0xe]  ;;  %v3496_v6 = vld [vmem:[%s5258_s2 + $0x28] sm:$0xf] }
  0x41   : > { %v1579_v7 = vsel %vm4543_vm9, %v3460_v51, %v1578_v10  ;;  %v991_v13 = vrot.slane %v989_v24, 4  ;;  %v994_v40 = vrot.slane %v992_v29, 5  ;;  %v998_v45 = vshll.u32 %v3408_v16, 16  ;;  %v3507_v5 = vld [vmem:[%s4310_s12 + $0x18] sm:$0xf] }
  0x42   : > { %v4661_v12 = vcombine.low %v1575_v35, %v1579_v7  ;;  %v931_v30 = vsel %vm4375_vm6, %v926_v61, %v4520_v53  ;;  %v945_v48 = vsel %vm4375_vm6, %v940_v28, %v4535_v8  ;;  %v959_v23 = vsel %vm4375_vm6, %v954_v36, %v958_v42 }
  0x43   : > { %v973_v24 = vsel %vm4375_vm6, %v968_v34, %v972_v2  ;;  %v981_v29 = vor.u32 %v980_v32, %v977_v11  ;;  %v995_v44 = vor.u32 %v994_v40, %v991_v13  ;;  %v1582_v53 = vrot.slane %v4512_v50, 5  ;;  %v3479_v11 = vld [vmem:[%s5258_s2 + $0x24] sm:$0xf] }
  0x44   : > { %v4682_v18 = vcombine.low %v931_v30, %v945_v48  ;;  %v1000_v51 = vrot.slane %v998_v45, 5  ;;  %v3462_v10 = vrot.slane %v3454_v21, 9  ;;  %v4684_v61 = vcombine.low %v959_v23, %v973_v24  ;;  %v3422_v48 = vld [vmem:[%s5258_s2 + $0x10] sm:$0xf] }
  0x45   : > { %3711 = vmatmul.mubr.msk.bf16.vlgmr.msra.gmra.mrb[8].mxu1 %vm573_vm5, %v4589_v46  ;;  %v982_v28 = vrot.slane %v981_v29, 4  ;;  %v996_v35 = vrot.slane %v995_v44, 4  ;;  %v1590_v7 = vrot.slane %v3406_v57, 5  ;;  %v3464_v36 = vrot.slane %v3456_v17, 9 }
  0x46   : > { %3714 = vmatprep.mubr.msk.bf16.mxu1 %vm573_vm5, %v4605_v19  ;;  %3719 = vmatpush3.bf16.msra.mxu1 %v4501_v41  ;;  %v1571_v41 = vsel %vm4543_vm9, %v3458_v25, %v1570_v14  ;;  %v984_v14 = vshll.u32 %v3406_v57, 16  ;;  %v3453_v25 = vld [vmem:[%s4310_s12 + $0x28] sm:$0xe]  ;;  %v1594_v2 = vrot.slane %v3408_v16, 5  ;;  %v1840_v24 = vsel %vm586_vm1, %v3479_v11, 0 }
  0x47   : > { %3984 = vmatprep.subr.msk.bf16.mxu1 %vm358_vm0, %v4270_v0  ;;  %v4654_v62 = vcombine.low %v1567_v52, %v1571_v41  ;;  %v3461_v9 = vrot.slane %v3453_v25, 9  ;;  %v1586_v52 = vrot.slane %v4538_v60, 5  ;;  %v3463_v41 = vrot.slane %v3455_v59, 9 }
  0x48   : > { %v986_v8 = vrot.slane %v984_v14, 5  ;;  %v1595_v60 = vsel %vm4543_vm9, %v3464_v36, %v1594_v2  ;;  %v1001_v16 = vsel %vm4375_vm6, %v996_v35, %v1000_v51  ;;  %v1327_v25 = vsel %vm586_vm1, %v4301_v4, 0  ;;  %v3478_v4 = vld [vmem:[%s5258_s2 + $0x20] sm:$0xf]  ;;  %v3556_v51 = vld [vmem:[%s4310_s12 + $0x48] sm:$0xe] }
  0x49   : > { %v1583_v42 = vsel %vm4543_vm9, %v3461_v9, %v1582_v53  ;;  %v1587_v50 = vsel %vm4543_vm9, %v3462_v10, %v1586_v52  ;;  %v1591_v32 = vsel %vm4543_vm9, %v3463_v41, %v1590_v7  ;;  %v1395_v17 = vsel %vm586_vm1, %v3422_v48, 0  ;;  %v4820_v7 = vld [vmem:[%s4310_s12 + $0x14] sm:$0x1] }
  0x4a   : > { %v4694_v34 = vcombine.low %v1583_v42, %v1587_v50  ;;  %v987_v57 = vsel %vm4375_vm6, %v982_v28, %v986_v8  ;;  %v4709_v13 = vcombine.low %v1591_v32, %v1595_v60  ;;  %v3444_v8 = vld [vmem:[%s5258_s2 + $0x18] sm:$0xf]  ;;  %v2729_v42 = vrot.slane %v4754_v39, 5  ;;  %v3465_v28 = vld [vmem:[%s5258_s2 + $0x1c] sm:$0xf] }
  0x4b   : > { %v4712_v40 = vcombine.low %v987_v57, %v1001_v16  ;;  %v3564_v22 = vrot.slane %v3556_v51, 9  ;;  %v2733_v43 = vrot.slane %v4761_v27, 5  ;;  %v1465_v41 = vsel %vm586_vm1, %v3444_v8, 0  ;;  %v4181_v32 = vld [vmem:[%s4310_s12 + $0x10] ss:$8 sps:$4 sm:$0xff]  }
  0x4c   : > { %v2019_v31 = vsel %vm586_vm1, %v3496_v6, 0  ;;  %v3511_v60 = vld [vmem:[%s4310_s12 + $0x28] sm:$0xf]  ;;  %v2120_v57 = vshll.u32 %v4820_v7, 16  ;;  %v4842_v51 = vld [vmem:[%s4310_s12 + $0x24] sm:$0x1] }
  0x4d   : > { %3715 = vmatmul.mubr.msk.bf16.gmra.mrb[12].mxu1 %vm573_vm5, %v4651_v56 }
  0x4e   : > { %3720 = vmatprep.mubr.msk.bf16.mxu1 %vm573_vm5, %v4591_v47 }
  0x55   : > { %3721 = vmatmul.mubr.msk.bf16.vlgmr.msra.gmra.mrb[8].mxu1 %vm573_vm5, %v4682_v18 }
  0x56   : > { %3724 = vmatprep.mubr.msk.bf16.mxu1 %vm573_vm5, %v4684_v61  ;;  %3779 = vmatpush3.bf16.msra.mxu1 %v4276_v1 }
  0x57   : > { %3985 = vmatprep.subr.msk.bf16.mxu1 %vm586_vm1, %v3479_v11 }
  0x5d   : > { %3725 = vmatmul.mubr.msk.bf16.gmra.mrb[12].mxu1 %vm573_vm5, %v4712_v40 }
  0x84   : > { %v1155_v14 = vpop.permute.xlu0 %1154 }
  0x85   : > { %v1159_v45 = vpop.permute.xlu1 %1158  ;;  %3730 = vmatprep.mubr.msk.bf16.mxu0 %vm345_vm2, %v1155_v14 }
  0x88   : > { %v1157_v30 = vpop.permute.xlu0 %1156 }
  0x89   : > { %v1161_v21 = vpop.permute.xlu1 %1160  ;;  %3731 = vmatmul.mubr.msk.bf16.vlgmr.msra.gmra.mrb[0].mxu0 %vm345_vm2, %v1157_v30 }
  0x8a   : > { %3739 = vmatpush3.bf16.msra.mxu0 %v1327_v25  ;;  %3734 = vmatprep.mubr.msk.bf16.mxu0 %vm345_vm2, %v1159_v45  ;;  %v3513_v45 = vld [vmem:[%s4310_s12 + $0x30] sm:$0xf]  ;;  %v3515_v25 = vld [vmem:[%s4310_s12 + $0x38] sm:$0xf] }
  0x8b   : > { %3981 = vmatprep.subr.msk.bf16.mxu0 %vm586_vm1, %v3422_v48 }
  0x8c   : > { %v1751_v23 = vpop.permute.xlu0 %1750 }
  0x8d   : > { %v1753_v29 = vpop.permute.xlu1 %1752  ;;  %3780 = vmatprep.mubr.msk.bf16.mxu1 %vm345_vm2, %v1751_v23  ;;  %v2156_v23 = vshll.u32 %v3511_v60, 16 }
  0x8e   : > { %3781 = vmatmul.mubr.msk.bf16.vlgmr.msra.gmra.mrb[16].mxu1 %vm345_vm2, %v1753_v29  ;;  %v4182_v29 = vld [vmem:[%s4310_s12 + $0x20] ss:$8 sps:$4 sm:$0xff]  }
  0x8f   : > { %3789 = vmatpush3.bf16.msra.mxu1 %v1840_v24  ;;  %v1623_v24 = vsel %vm586_vm1, %v3465_v28, 0 }
  0x90   : > { %v4731_v44 = vpop.permute.xlu0 %2376  ;;  %3986 = vmatprep.subr.msk.bf16.mxu1 %vm586_vm1, %v3478_v4 }
  0x91   : > { %v4734_v59 = vpop.permute.xlu1 %2378  ;;  %3735 = vmatmul.mubr.msk.bf16.gmra.mrb[4].mxu0 %vm345_vm2, %v1161_v21  ;;  %v2153_v21 = vshrl.u32 %v3511_v60, 16 }
  0x92   : > { %3740 = vmatprep.mubr.msk.bf16.mxu0 %vm573_vm5, %v3432_v37  ;;  %v3555_v37 = vld [vmem:[%s4310_s12 + $0x40] sm:$0xe] }
  0x93   : > { %v3563_v10 = vrot.slane %v3555_v37, 9 }
  0x94   : > { %v1755_v9 = vpop.permute.xlu0 %1754 }
  0x95   : > { %v1757_v53 = vpop.permute.xlu1 %1756  ;;  %3784 = vmatprep.mubr.msk.bf16.mxu1 %vm345_vm2, %v1755_v9  ;;  %v4774_v55 = vsel %vm4543_vm9, %v3563_v10, %v2729_v42  ;;  %v2170_v9 = vshll.u32 %v3513_v45, 16 }
  0x96   : > { %3785 = vmatmul.mubr.msk.bf16.gmra.mrb[20].mxu1 %vm345_vm2, %v1757_v53  ;;  %v2181_v53 = vshrl.u32 %v3515_v25, 16 }
  0x97   : > { %3790 = vmatprep.mubr.msk.bf16.mxu1 %vm573_vm5, %v4591_v47 }
  0x99   : > { %3741 = vmatmul.mubr.msk.bf16.vlgmr.msra.gmra.mrb[8].mxu0 %vm573_vm5, %v3433_v49  ;;  %v1908_v49 = vsel %vm586_vm1, %v3478_v4, 0  ;;  %v2167_v4 = vshrl.u32 %v3513_v45, 16  ;;  %v2383_v38 = vpop.permute.xlu1 %2382 }
  0x9a   : > { %3749 = vmatpush3.bf16.msra.mxu0 %v1395_v17  ;;  %3744 = vmatprep.mubr.msk.bf16.mxu0 %vm573_vm5, %v3434_v20  ;;  %v4778_v20 = vsel %vm4543_vm9, %v3564_v22, %v2733_v43  ;;  %v2184_v17 = vshll.u32 %v3515_v25, 16  ;;  %v4847_v22 = vld [vmem:[%s4310_s12 + $0x2c] sm:$0x1] }
  0x9b   : > { %3982 = vmatprep.subr.msk.bf16.mxu0 %vm586_vm1, %v3444_v8  ;;  %v3569_v52 = vcombine.low %v4774_v55, %v4778_v20  ;;  %v2122_v8 = vrot.slane %v2120_v57, 5 }
  0x9e   : > { %3791 = vmatmul.mubr.msk.bf16.vlgmr.msra.gmra.mrb[24].mxu1 %vm573_vm5, %v4682_v18 }
  0x9f   : > { %3794 = vmatprep.mubr.msk.bf16.mxu1 %vm573_vm5, %v4684_v61  ;;  %3799 = vmatpush3.bf16.msra.mxu1 %v1908_v49  ;;  %v2155_v49 = vrot.slane %v2153_v21, 4 }
  0xa0   : > { %3987 = vmatprep.subr.msk.bf16.mxu1 %vm586_vm1, %v3496_v6  ;;  %v2158_v6 = vrot.slane %v2156_v23, 5 }
  0xa1   : > { %3745 = vmatmul.mubr.msk.bf16.gmra.mrb[12].mxu0 %vm573_vm5, %v3435_v33 }
  0xa2   : > { %3750 = vmatprep.mubr.msk.bf16.mxu0 %vm573_vm5, %v4408_v63  ;;  %v3505_v63 = vld [vmem:[%s4310_s12 + $0x10] sm:$0xf] }
  0xa3   : > { %v2111_v33 = vshrl.u32 %v3505_v63, 16  ;;  %v2114_v35 = vshll.u32 %v3505_v63, 16  ;;  %v3517_v63 = vld [vmem:[%s4310_s12 + $0x40] sm:$0xf] }
  0xa4   : > { %v2198_v60 = vshll.u32 %v3517_v63, 16 }
  0xa5   : > { %v2113_v36 = vrot.slane %v2111_v33, 4  ;;  %v2116_v50 = vrot.slane %v2114_v35, 5  ;;  %v2183_v33 = vrot.slane %v2181_v53, 4  ;;  %v2186_v35 = vrot.slane %v2184_v17, 5 }
  0xa6   : > { %3795 = vmatmul.mubr.msk.bf16.gmra.mrb[28].mxu1 %vm573_vm5, %v4712_v40 }
  0xa7   : > { %3800 = vmatprep.mubr.msk.bf16.mxu1 %vm573_vm5, %v4525_v58  ;;  %v3521_v58 = vld [vmem:[%s5258_s2 + $0x2c] sm:$0xf]  ;;  %v2117_v16 = vor.u32 %v2116_v50, %v2113_v36  ;;  %v2162_v36 = vshll.u32 %v4847_v22, 16  ;;  %v4858_v50 = vld [vmem:[%s4310_s12 + $0x34] sm:$0x1]  ;;  %v2187_v45 = vor.u32 %v2186_v35, %v2183_v33 }
  0xa9   : > { %3751 = vmatmul.mubr.msk.bf16.vlgmr.msra.gmra.mrb[8].mxu0 %vm573_vm5, %v4436_v26  ;;  %v2125_v26 = vshrl.u32 %v3507_v5, 16 }
  0xaa   : > { %3759 = vmatpush3.bf16.msra.mxu0 %v1465_v41  ;;  %3754 = vmatprep.mubr.msk.bf16.mxu0 %vm573_vm5, %v4458_v54  ;;  %v2128_v54 = vshll.u32 %v3507_v5, 16  ;;  %v4183_v41 = vld [vmem:[%s4310_s12 + $0x30] ss:$8 sps:$4 sm:$0xff]   ;;  %v2169_v5 = vrot.slane %v2167_v4, 4 }
  0xab   : > { %3983 = vmatprep.subr.msk.bf16.mxu0 %vm586_vm1, %v3465_v28  ;;  %v2127_v2 = vrot.slane %v2125_v26, 4  ;;  %v2249_v28 = vsel %vm586_vm1, %v3521_v58, 0  ;;  %v3519_v26 = vld [vmem:[%s4310_s12 + $0x48] sm:$0xf] }
  0xac   : > { %v2130_v11 = vrot.slane %v2128_v54, 5  ;;  %v2148_v54 = vshll.u32 %v4842_v51, 16  ;;  %v2209_v57 = vshrl.u32 %v3519_v26, 16 }
  0xae   : > { %3801 = vmatmul.mubr.msk.bf16.vlgmr.msra.gmra.mrb[24].mxu1 %vm573_vm5, %v4589_v46  ;;  %v4825_v46 = vld [vmem:[%s4310_s12 + $0x1c] sm:$0x1]  ;;  %v2131_v30 = vor.u32 %v2130_v11, %v2127_v2  ;;  %v2211_v53 = vrot.slane %v2209_v57, 4 }
  0xaf   : > { %3804 = vmatprep.mubr.msk.bf16.mxu1 %vm573_vm5, %v4605_v19  ;;  %3809 = vmatpush3.bf16.msra.mxu1 %v2019_v31  ;;  %v3509_v19 = vld [vmem:[%s4310_s12 + $0x20] sm:$0xf]  ;;  %v2172_v31 = vrot.slane %v2170_v9, 5  ;;  %v4861_v2 = vld [vmem:[%s4310_s12 + $0x3c] sm:$0x1]  ;;  %v2200_v9 = vrot.slane %v2198_v60, 5 }
  0xb0   : > { %3988 = vmatprep.subr.msk.bf16.mxu1 %vm586_vm1, %v3521_v58  ;;  %v2139_v14 = vshrl.u32 %v3509_v19, 16  ;;  %v2142_v48 = vshll.u32 %v3509_v19, 16  ;;  %v2132_v42 = vrot.slane %v2131_v30, 4  ;;  %v2159_v19 = vor.u32 %v2158_v6, %v2155_v49  ;;  %v3544_v60 = vld [vmem:[%s5258_s2 + $0x38] sm:$0xf] }
  0xb1   : > { %3755 = vmatmul.mubr.msk.bf16.gmra.mrb[12].mxu0 %vm573_vm5, %v4469_v3  ;;  %v2134_v3 = vshll.u32 %v4825_v46, 16  ;;  %v2190_v25 = vshll.u32 %v4861_v2, 16  ;;  %v2150_v30 = vrot.slane %v2148_v54, 5 }
  0xb2   : > { %3760 = vmatprep.mubr.msk.bf16.mxu0 %vm573_vm5, %v4591_v47  ;;  %v2141_v10 = vrot.slane %v2139_v14, 4  ;;  %v2144_v43 = vrot.slane %v2142_v48, 5  ;;  %v2176_v14 = vshll.u32 %v4858_v50, 16  ;;  %v4184_v48 = vld [vmem:[%s4310_s12 + $0x40] ss:$8 sps:$4 sm:$0xff]  }
  0xb3   : > { %v2136_v37 = vrot.slane %v2134_v3, 5  ;;  %v2173_v3 = vor.u32 %v2172_v31, %v2169_v5 }
  0xb4   : > { %v2145_v11 = vor.u32 %v2144_v43, %v2141_v10  ;;  %v2192_v10 = vrot.slane %v2190_v25, 5  ;;  %v2204_v43 = vshll.u32 %v4754_v39, 16  ;;  %v3535_v39 = vld [vmem:[%s5258_s2 + $0x34] sm:$0xf] }
  0xb5   : > { %v2137_v58 = vsel %vm4375_vm6, %v2132_v42, %v2136_v37  ;;  %v2188_v37 = vrot.slane %v2187_v45, 4  ;;  %v3565_v45 = vld [vmem:[%s5258_s2 + $0x3c] sm:$0xf] }
  0xb6   : > { %3805 = vmatmul.mubr.msk.bf16.gmra.mrb[28].mxu1 %vm573_vm5, %v4651_v56  ;;  %v2118_v56 = vrot.slane %v2117_v16, 4  ;;  %v2212_v16 = vshll.u32 %v3519_v26, 16  ;;  %v2146_v23 = vrot.slane %v2145_v11, 4  ;;  %v2381_v11 = vpop.permute.xlu0 %2380 }
  0xb7   : > { %3810 = vmatprep.mubr.msk.bf16.mxu1 %vm573_vm5, %v4181_v32  ;;  %v2195_v32 = vshrl.u32 %v3517_v63, 16  ;;  %v2193_v5 = vsel %vm4375_vm6, %v2188_v37, %v2192_v10  ;;  %v2725_v10 = vrot.slane %v4861_v2, 5 }
  0xb8   : > { %v2214_v17 = vrot.slane %v2212_v16, 5  ;;  %v2151_v42 = vsel %vm4375_vm6, %v2146_v23, %v2150_v30  ;;  %v2705_v30 = vrot.slane %v4820_v7, 5 }
  0xb9   : > { %3761 = vmatmul.mubr.msk.bf16.vlgmr.msra.gmra.mrb[8].mxu0 %vm573_vm5, %v4682_v18  ;;  %v2197_v4 = vrot.slane %v2195_v32, 4 }
  0xba   : > { %3769 = vmatpush3.bf16.msra.mxu0 %v1623_v24  ;;  %3764 = vmatprep.mubr.msk.bf16.mxu0 %vm573_vm5, %v4684_v61  ;;  %v2160_v24 = vrot.slane %v2159_v19, 4  ;;  %v3534_v19 = vld [vmem:[%s5258_s2 + $0x30] sm:$0xf] }
  0xbb   : > { %3989 = vmatprep.subr.msk.bf16.mxu0 %vm358_vm0, %v4270_v0  ;;  %v2123_v0 = vsel %vm4375_vm6, %v2118_v56, %v2122_v8  ;;  %v2174_v56 = vrot.slane %v2173_v3, 4  ;;  %v2178_v8 = vrot.slane %v2176_v14, 5  ;;  %v2201_v6 = vor.u32 %v2200_v9, %v2197_v4  ;;  %v3554_v4 = vld [vmem:[%s4310_s12 + $0x38] sm:$0xe] }
  0xbc   : > { %v4876_v21 = vcombine.low %v2123_v0, %v2137_v58  ;;  %v2466_v58 = vsel %vm586_vm1, %v3535_v39, 0  ;;  %v3562_v37 = vrot.slane %v3554_v4, 9  ;;  %vm3196_vm0 = vcmask 57344  }
  0xbd   : > { %v2179_v63 = vsel %vm4375_vm6, %v2174_v56, %v2178_v8  ;;  %v2202_v35 = vrot.slane %v2201_v6, 4  ;;  %v2721_v8 = vrot.slane %v4858_v50, 5 }
  0xbe   : > { %3811 = vmatmul.mubr.msk.bf16.vlgmr.msra.gmra.mrb[24].mxu1 %vm573_vm5, %v4182_v29  ;;  %v2164_v29 = vrot.slane %v2162_v36, 5  ;;  %v3524_v33 = vcombine.low %v2179_v63, %v2193_v5 }
  0xbf   : > { %3814 = vmatprep.mubr.msk.bf16.mxu1 %vm573_vm5, %v4183_v41  ;;  %3819 = vmatpush3.bf16.msra.mxu1 %v2249_v28  ;;  %v2215_v41 = vor.u32 %v2214_v17, %v2211_v53  ;;  %v2218_v28 = vshll.u32 %v4761_v27, 16  ;;  %v2206_v27 = vrot.slane %v2204_v43, 5  ;;  %v2713_v53 = vrot.slane %v4842_v51, 5 }
  0xc0   : > { %v2165_v49 = vsel %vm4375_vm6, %v2160_v24, %v2164_v29  ;;  %v3552_v24 = vld [vmem:[%s4310_s12 + $0x28] sm:$0xe]  ;;  %v3553_v29 = vld [vmem:[%s4310_s12 + $0x30] sm:$0xe]  ;;  %v2717_v17 = vrot.slane %v4847_v22, 5  ;;  %v2726_v22 = vsel %vm4543_vm9, %v3562_v37, %v2725_v10 }
  0xc1   : > { %3765 = vmatmul.mubr.msk.bf16.gmra.mrb[12].mxu0 %vm573_vm5, %v4712_v40  ;;  %v3523_v31 = vcombine.low %v2151_v42, %v2165_v49  ;;  %v2216_v26 = vrot.slane %v2215_v41, 4  ;;  %v2220_v54 = vrot.slane %v2218_v28, 5  ;;  %v2207_v36 = vsel %vm4375_vm6, %v2202_v35, %v2206_v27 }
  0xc2   : > { %3770 = vmatprep.mubr.msk.bf16.mxu0 %vm573_vm5, %v4654_v62  ;;  %v3561_v56 = vrot.slane %v3553_v29, 9 }
  0xc4   : > { %v2722_v51 = vsel %vm4543_vm9, %v3561_v56, %v2721_v8 }
  0xc5   : > { %v3568_v49 = vcombine.low %v2722_v51, %v2726_v22 }
  0xc6   : > { %3815 = vmatmul.mubr.msk.bf16.gmra.mrb[28].mxu1 %vm573_vm5, %v4184_v48 }
  0xc7   : > { %3820 = vmatprep.mubr.msk.bf16.mxu1 %vm573_vm5, %v4876_v21 }
  0xc9   : > { %3771 = vmatmul.mubr.msk.bf16.vlgmr.msra.gmra.mrb[8].mxu0 %vm573_vm5, %v4661_v12 }
  0xca   : > { %3829 = vmatpush3.bf16.msra.mxu0 %v4276_v1  ;;  %3774 = vmatprep.mubr.msk.bf16.mxu0 %vm573_vm5, %v4694_v34  ;;  %v2221_v1 = vsel %vm4375_vm6, %v2216_v26, %v2220_v54 }
  0xcb   : > { %3990 = vmatprep.subr.msk.bf16.mxu0 %vm586_vm1, %v3535_v39  ;;  %v3525_v0 = vcombine.low %v2207_v36, %v2221_v1 }
  0xce   : > { %3821 = vmatmul.mubr.msk.bf16.vlgmr.msra.gmra.mrb[24].mxu1 %vm573_vm5, %v3523_v31 }
  0xcf   : > { %3824 = vmatprep.mubr.msk.bf16.mxu1 %vm573_vm5, %v3524_v33 }
  0xd1   : > { %3775 = vmatmul.mubr.msk.bf16.gmra.mrb[12].mxu0 %vm573_vm5, %v4709_v13 }
  0xd2   : > { %3830 = vmatprep.mubr.msk.bf16.mxu0 %vm345_vm2, %v4731_v44  ;;  %v2534_v44 = vsel %vm586_vm1, %v3534_v19, 0 }
  0xd6   : > { %3825 = vmatmul.mubr.msk.bf16.gmra.mrb[28].mxu1 %vm573_vm5, %v3525_v0 }
  0xd9   : > { %3831 = vmatmul.mubr.msk.bf16.vlgmr.msra.gmra.mrb[16].mxu0 %vm345_vm2, %v4734_v59 }
  0xda   : > { %3839 = vmatpush3.bf16.msra.mxu0 %v2466_v58  ;;  %3834 = vmatprep.mubr.msk.bf16.mxu0 %vm345_vm2, %v2381_v11 }
  0xdb   : > { %3991 = vmatprep.subr.msk.bf16.mxu0 %vm586_vm1, %v3534_v19 }
  0xe1   : > { %3835 = vmatmul.mubr.msk.bf16.gmra.mrb[20].mxu0 %vm345_vm2, %v2383_v38 }
  0xe2   : > { %3840 = vmatprep.mubr.msk.bf16.mxu0 %vm573_vm5, %v4654_v62 }
  0xe6   : > { %v4923_v32 = vpop.f32.mrb[0].mxu1 }
  0xe7   : > { %v4928_v59 = vpop.f32.mrb[1].mxu1 }
  0xe8   : > { %v4932_v57 = vpop.f32.mrb[2].mxu1 }
  0xe9   : > { %3841 = vmatmul.mubr.msk.bf16.vlgmr.msra.gmra.mrb[24].mxu0 %vm573_vm5, %v4661_v12  ;;  %v4936_v62 = vpop.f32.mrb[3].mxu1 }
  0xea   : > { %3849 = vmatpush3.bf16.msra.mxu0 %v2534_v44  ;;  %3844 = vmatprep.mubr.msk.bf16.mxu0 %vm573_vm5, %v4694_v34  ;;  %v2604_v34 = vsel %vm586_vm1, %v3544_v60, 0 }
  0xeb   : > { %3992 = vmatprep.subr.msk.bf16.mxu0 %vm586_vm1, %v3544_v60 }
  0xee   : > { %v4939_v16 = vpop.f32.mrb[4].mxu1 }
  0xef   : > { %v4941_v3 = vpop.f32.mrb[5].mxu1 }
  0xf0   : > { %v4945_v12 = vpop.f32.mrb[6].mxu1 }
  0xf1   : > { %3845 = vmatmul.mubr.msk.bf16.gmra.mrb[28].mxu0 %vm573_vm5, %v4709_v13  ;;  %v4949_v14 = vpop.f32.mrb[7].mxu1  ;;  %v3550_v13 = vld [vmem:[%s4310_s12 + $0x18] sm:$0xe] }
  0xf2   : > { %3850 = vmatprep.mubr.msk.bf16.mxu0 %vm573_vm5, %v4591_v47  ;;  %v3549_v47 = vld [vmem:[%s4310_s12 + $0x10] sm:$0xe]  ;;  %v3558_v48 = vrot.slane %v3550_v13, 9 }
  0xf3   : > { %v3557_v25 = vrot.slane %v3549_v47, 9 }
  0xf9   : > { %3851 = vmatmul.mubr.msk.bf16.vlgmr.msra.gmra.mrb[24].mxu0 %vm573_vm5, %v4682_v18  ;;  %v2762_v18 = vsel %vm586_vm1, %v3565_v45, 0 }
  0xfa   : > { %3859 = vmatpush3.bf16.msra.mxu0 %v2604_v34  ;;  %3854 = vmatprep.mubr.msk.bf16.mxu0 %vm573_vm5, %v4684_v61  ;;  %v2709_v61 = vrot.slane %v4825_v46, 5  ;;  %v3560_v46 = vrot.slane %v3552_v24, 9 }
  0xfb   : > { %3993 = vmatprep.subr.msk.bf16.mxu0 %vm586_vm1, %v3565_v45 }
  0xfc   : > { %v2710_v23 = vsel %vm4543_vm9, %v3558_v48, %v2709_v61  ;;  %v2718_v43 = vsel %vm4543_vm9, %v3560_v46, %v2717_v17 }
 0x101   : > { %3855 = vmatmul.mubr.msk.bf16.gmra.mrb[28].mxu0 %vm573_vm5, %v4712_v40  ;;  %v3551_v40 = vld [vmem:[%s4310_s12 + $0x20] sm:$0xe]  ;;  %s4212_s12 = smov 4  }
 0x102   : > { %3860 = vmatprep.mubr.msk.bf16.mxu0 %vm573_vm5, %v4876_v21  ;;  %v2706_v21 = vsel %vm4543_vm9, %v3557_v25, %v2705_v30  ;;  %v3559_v9 = vrot.slane %v3551_v40, 9 }
 0x103   : > { %v3566_v7 = vcombine.low %v2706_v21, %v2710_v23 }
 0x104   : > { %v2714_v42 = vsel %vm4543_vm9, %v3559_v9, %v2713_v53 }
 0x105   : > { %v3567_v50 = vcombine.low %v2714_v42, %v2718_v43 }
 0x109   : > { %3861 = vmatmul.mubr.msk.bf16.vlgmr.msra.gmra.mrb[24].mxu0 %vm573_vm5, %v3523_v31 }
 0x10a   : > { %3869 = vmatpush3.bf16.msra.mxu0 %v2762_v18  ;;  %3864 = vmatprep.mubr.msk.bf16.mxu0 %vm573_vm5, %v3524_v33 }
 0x111   : > { %3865 = vmatmul.mubr.msk.bf16.gmra.mrb[28].mxu0 %vm573_vm5, %v3525_v0 }
 0x112   : > { %3870 = vmatprep.mubr.msk.bf16.mxu0 %vm573_vm5, %v3566_v7 }
 0x119   : > { %3871 = vmatmul.mubr.msk.bf16.vlgmr.msra.gmra.mrb[24].mxu0 %vm573_vm5, %v3567_v50 }
 0x11a   : > { %3874 = vmatprep.mubr.msk.bf16.mxu0 %vm573_vm5, %v3568_v49 }
 0x121   : > { %3875 = vmatmul.mubr.msk.bf16.gmra.mrb[28].mxu0 %vm573_vm5, %v3569_v52 }
 0x128   : > { %v3722_v2 = vpop.f32.mrb[8].mxu1 }
 0x129   : > { %v1065_v6 = vpop.f32.mrb[9].mxu1  ;;  %v1127_v41 = vmul.f32 %v3722_v2, %v3722_v2  ;;  %v1107_v15 = vsel %vm345_vm2, %v3722_v2, 0.0 }
 0x12a   : > { %v1104_v28 = vsel %vm345_vm2, %v1065_v6, 0.0  ;;  %v1125_v63 = vmul.f32 %v1065_v6, %v1065_v6  ;;  %v3723_v5 = vpop.f32.mrb[10].mxu1 }
 0x12b   : > { %v4029_v39 = vpack.i.bf16 %v3723_v5, %v3722_v2  ;;  %v1128_v31 = vmul.f32 %v3723_v5, %v3723_v5  ;;  %v1068_v27 = vpop.f32.mrb[11].mxu1  ;;  %v1136_v52 = vsel %vm345_vm2, %v1127_v41, 0.0  ;;  %v1109_v54 = vsel %vm345_vm2, %v3723_v5, 0.0 }
 0x12c   : > { %v1133_v33 = vsel %vm345_vm2, %v1125_v63, 0.0  ;;  %v4034_v35 = vpack.i.bf16 %v1068_v27, %v1065_v6  ;;  %v1105_v26 = vsel %vm345_vm2, %v1068_v27, 0.0  ;;  %v1126_v55 = vmul.f32 %v1068_v27, %v1068_v27 }
 0x12d   : > { %v1106_v20 = vadd.f32 %v1105_v26, %v1104_v28  ;;  %4030 = vrot.lane.b32.xlu1 %v4029_v39, %s4212_s12  ;;  %v1138_v58 = vsel %vm345_vm2, %v1128_v31, 0.0 }
 0x12e   : > { %v1134_v36 = vsel %vm345_vm2, %v1126_v55, 0.0  ;;  %4035 = vrot.lane.b32.xlu0 %v4034_v35, %s4212_s12 }
 0x12f   : > { %v1108_v1 = vadd.f32 %v1107_v15, %v1106_v20  ;;  %v1135_v0 = vadd.f32 %v1134_v36, %v1133_v33 }
 0x130   : > { %v3726_v11 = vpop.f32.mrb[12].mxu1 }
 0x131   : > { %v1137_v19 = vadd.f32 %v1136_v52, %v1135_v0  ;;  %v1081_v38 = vpop.f32.mrb[13].mxu1  ;;  %v1110_v44 = vadd.f32 %v1109_v54, %v1108_v1  ;;  %v1131_v47 = vmul.f32 %v3726_v11, %v3726_v11  ;;  %v1115_v48 = vsel %vm345_vm2, %v3726_v11, 0.0 }
 0x132   : > { %v1111_v60 = vsel %vm345_vm2, %v1081_v38, 0.0  ;;  %v1129_v34 = vmul.f32 %v1081_v38, %v1081_v38  ;;  %v3727_v45 = vpop.f32.mrb[14].mxu1 }
 0x133   : > { %v1112_v13 = vadd.f32 %v1111_v60, %v1110_v44  ;;  %v1139_v18 = vadd.f32 %v1138_v58, %v1137_v19  ;;  %v4039_v25 = vpack.i.bf16 %v3727_v45, %v3726_v11  ;;  %v1084_v30 = vpop.f32.mrb[15].mxu1  ;;  %v1132_v23 = vmul.f32 %v3727_v45, %v3727_v45 }
 0x134   : > { %v1140_v61 = vsel %vm345_vm2, %v1129_v34, 0.0  ;;  %v4044_v40 = vpack.i.bf16 %v1084_v30, %v1081_v38  ;;  %v1113_v24 = vsel %vm345_vm2, %v1084_v30, 0.0  ;;  %v1130_v29 = vmul.f32 %v1084_v30, %v1084_v30 }
 0x135   : > { %v1141_v21 = vadd.f32 %v1140_v61, %v1139_v18  ;;  %4040 = vrot.lane.b32.xlu1 %v4039_v25, %s4212_s12  ;;  %v1114_v4 = vadd.f32 %v1113_v24, %v1112_v13  ;;  %v1144_v9 = vsel %vm345_vm2, %v1131_v47, 0.0  ;;  %v1117_v7 = vsel %vm345_vm2, %v3727_v45, 0.0 }
 0x136   : > { %4045 = vrot.lane.b32.xlu0 %v4044_v40, %s4212_s12  ;;  %v1142_v53 = vsel %vm345_vm2, %v1130_v29, 0.0  ;;  %v1146_v56 = vsel %vm345_vm2, %v1132_v23, 0.0 }
 0x137   : > { %v1116_v46 = vadd.f32 %v1115_v48, %v1114_v4  ;;  %v1143_v17 = vadd.f32 %v1142_v53, %v1141_v21 }
 0x139   : > { %v1118_v8 = vadd.f32 %v1117_v7, %v1116_v46  ;;  %v1145_v37 = vadd.f32 %v1144_v9, %v1143_v17 }
 0x13b   : > { %v5019_v10 = vadd.f32 %v1146_v56, %v1145_v37  ;;  %v1119_v0 = vrot.slane %v1118_v8, 4 }
 0x13d   : > { %v1120_v18 = vadd.f32 %v1119_v0, %v1118_v8  ;;  %v1148_v48 = vrot.slane %v5019_v10, 4 }
 0x15c   : > { %v3732_v42 = vpop.f32.mrb[0].mxu0 }
 0x15d   : > { %v1208_v43 = vpop.f32.mrb[1].mxu0 }
 0x15e   : > { %v3733_v51 = vpop.f32.mrb[2].mxu0 }
 0x15f   : > { %v4049_v22 = vpack.i.bf16 %v3733_v51, %v3732_v42  ;;  %v1211_v50 = vpop.f32.mrb[3].mxu0  ;;  %v1121_v42 = vrot.slane %v1120_v18, 2 }
 0x160   : > { %v4059_v49 = vpack.i.bf16 %v1211_v50, %v1208_v43  ;;  %v5031_v43 = vadd.f32 %v1148_v48, %v5019_v10 }
 0x161   : > { %4050 = vrot.lane.b32.xlu1 %v4049_v22, %s4213_s28  ;;  %v3782_v2 = vpop.f32.mrb[16].mxu1 }
 0x162   : > { %4060 = vrot.lane.b32.xlu0 %v4059_v49, %s4213_s28  ;;  %v1804_v6 = vpop.f32.mrb[17].mxu1 }
 0x163   : > { %v3783_v41 = vpop.f32.mrb[18].mxu1 }
 0x164   : > { %v4054_v28 = vpack.i.bf16 %v3783_v41, %v3782_v2  ;;  %v3736_v63 = vpop.f32.mrb[4].mxu0  ;;  %v1807_v5 = vpop.f32.mrb[19].mxu1 }
 0x165   : > { %v4064_v15 = vpack.i.bf16 %v1807_v5, %v1804_v6  ;;  %v1224_v39 = vpop.f32.mrb[5].mxu0 }
 0x166   : > { %v3737_v31 = vpop.f32.mrb[6].mxu0  ;;  %4055 = vrot.lane.b32.xlu1 %v4054_v28, %s4214_s29 }
 0x167   : > { %v4069_v27 = vpack.i.bf16 %v3737_v31, %v3736_v63  ;;  %v1227_v33 = vpop.f32.mrb[7].mxu0  ;;  %4065 = vrot.lane.b32.xlu0 %v4064_v15, %s4214_s29 }
 0x168   : > { %v4079_v35 = vpack.i.bf16 %v1227_v33, %v1224_v39 }
 0x169   : > { %v3786_v26 = vpop.f32.mrb[20].mxu1 }
 0x16a   : > { %4070 = vrot.lane.b32.xlu1 %v4069_v27, %s4213_s28  ;;  %v1820_v55 = vpop.f32.mrb[21].mxu1 }
 0x16b   : > { %4080 = vrot.lane.b32.xlu0 %v4079_v35, %s4213_s28  ;;  %v3787_v20 = vpop.f32.mrb[22].mxu1 }
 0x16c   : > { %v4074_v52 = vpack.i.bf16 %v3787_v20, %v3786_v26  ;;  %v1823_v54 = vpop.f32.mrb[23].mxu1 }
 0x16d   : > { %v4084_v36 = vpack.i.bf16 %v1823_v54, %v1820_v55 }
 0x16e   : > { %4075 = vrot.lane.b32.xlu1 %v4074_v52, %s4214_s29 }
 0x16f   : > { %4085 = vrot.lane.b32.xlu0 %v4084_v36, %s4214_s29 }
 0x19c   : > { %v3772_v1 = vpop.f32.mrb[8].mxu0 }
 0x19d   : > { %v1659_v58 = vpop.f32.mrb[9].mxu0  ;;  %v1721_v38 = vmul.f32 %v3772_v1, %v3772_v1  ;;  %v1701_v61 = vsel %vm345_vm2, %v3772_v1, 0.0 }
 0x19e   : > { %v1719_v11 = vmul.f32 %v1659_v58, %v1659_v58  ;;  %v3773_v19 = vpop.f32.mrb[10].mxu0  ;;  %v1698_v34 = vsel %vm345_vm2, %v1659_v58, 0.0 }
 0x19f   : > { %v4089_v44 = vpack.i.bf16 %v3773_v19, %v3772_v1  ;;  %v1662_v60 = vpop.f32.mrb[11].mxu0  ;;  %v1722_v24 = vmul.f32 %v3773_v19, %v3773_v19  ;;  %v1730_v7 = vsel %vm345_vm2, %v1721_v38, 0.0  ;;  %v1703_v49 = vsel %vm345_vm2, %v3773_v19, 0.0 }
 0x1a0   : > { %v4099_v45 = vpack.i.bf16 %v1662_v60, %v1659_v58  ;;  %v1699_v47 = vsel %vm345_vm2, %v1662_v60, 0.0  ;;  %v1720_v13 = vmul.f32 %v1662_v60, %v1662_v60  ;;  %v1727_v40 = vsel %vm345_vm2, %v1719_v11, 0.0 }
 0x1a1   : > { %v1700_v25 = vadd.f32 %v1699_v47, %v1698_v34  ;;  %4090 = vrot.lane.b32.xlu1 %v4089_v44, %s4215_s30  ;;  %v3822_v30 = vpop.f32.mrb[24].mxu1  ;;  %v1732_v2 = vsel %vm345_vm2, %v1722_v24, 0.0  ;;  %v5045_v34 = vadd.f32 %v1121_v42, %v1120_v18 }
 0x1a2   : > { %v1728_v21 = vsel %vm345_vm2, %v1720_v13, 0.0  ;;  %4100 = vrot.lane.b32.xlu0 %v4099_v45, %s4215_s30  ;;  %v2285_v23 = vpop.f32.mrb[25].mxu1  ;;  %v2347_v56 = vmul.f32 %v3822_v30, %v3822_v30  ;;  %v2327_v6 = vsel %vm345_vm2, %v3822_v30, 0.0 }
 0x1a3   : > { %v1702_v29 = vadd.f32 %v1701_v61, %v1700_v25  ;;  %v1729_v4 = vadd.f32 %v1728_v21, %v1727_v40  ;;  %v3823_v9 = vpop.f32.mrb[26].mxu1  ;;  %v2345_v8 = vmul.f32 %v2285_v23, %v2285_v23  ;;  %v2324_v51 = vsel %vm345_vm2, %v2285_v23, 0.0 }
 0x1a4   : > { %v3776_v53 = vpop.f32.mrb[12].mxu0  ;;  %v2288_v46 = vpop.f32.mrb[27].mxu1  ;;  %v4094_v22 = vpack.i.bf16 %v3823_v9, %v3822_v30  ;;  %v2356_v10 = vsel %vm345_vm2, %v2347_v56, 0.0  ;;  %v2348_v26 = vmul.f32 %v3823_v9, %v3823_v9  ;;  %v2329_v45 = vsel %vm345_vm2, %v3823_v9, 0.0 }
 0x1a5   : > { %v1731_v17 = vadd.f32 %v1730_v7, %v1729_v4  ;;  %v1675_v37 = vpop.f32.mrb[13].mxu0  ;;  %v4104_v41 = vpack.i.bf16 %v2288_v46, %v2285_v23  ;;  %v2353_v63 = vsel %vm345_vm2, %v2345_v8, 0.0  ;;  %v2325_v5 = vsel %vm345_vm2, %v2288_v46, 0.0 }
 0x1a6   : > { %v3777_v50 = vpop.f32.mrb[14].mxu0  ;;  %v2346_v15 = vmul.f32 %v2288_v46, %v2288_v46  ;;  %v1704_v39 = vadd.f32 %v1703_v49, %v1702_v29  ;;  %4095 = vrot.lane.b32.xlu1 %v4094_v22, %s4216_s6  ;;  %v2326_v31 = vadd.f32 %v2325_v5, %v2324_v51  ;;  %v1705_v27 = vsel %vm345_vm2, %v1675_v37, 0.0 }
 0x1a7   : > { %v1678_v28 = vpop.f32.mrb[15].mxu0  ;;  %v1723_v33 = vmul.f32 %v1675_v37, %v1675_v37  ;;  %4105 = vrot.lane.b32.xlu0 %v4104_v41, %s4216_s6  ;;  %v1733_v52 = vadd.f32 %v1732_v2, %v1731_v17  ;;  %v1725_v36 = vmul.f32 %v3776_v53, %v3776_v53  ;;  %v4109_v38 = vpack.i.bf16 %v3777_v50, %v3776_v53 }
 0x1a8   : > { %v2354_v55 = vsel %vm345_vm2, %v2346_v15, 0.0  ;;  %v1706_v20 = vadd.f32 %v1705_v27, %v1704_v39  ;;  %v2328_v1 = vadd.f32 %v2327_v6, %v2326_v31  ;;  %v1726_v13 = vmul.f32 %v3777_v50, %v3777_v50 }
 0x1a9   : > { %v3826_v35 = vpop.f32.mrb[28].mxu1  ;;  %v2355_v0 = vadd.f32 %v2354_v55, %v2353_v63  ;;  %v1734_v58 = vsel %vm345_vm2, %v1723_v33, 0.0  ;;  %v4119_v30 = vpack.i.bf16 %v1678_v28, %v1675_v37  ;;  %v1707_v48 = vsel %vm345_vm2, %v1678_v28, 0.0 }
 0x1aa   : > { %v2301_v54 = vpop.f32.mrb[29].mxu1  ;;  %v1735_v19 = vadd.f32 %v1734_v58, %v1733_v52  ;;  %v1724_v61 = vmul.f32 %v1678_v28, %v1678_v28  ;;  %4110 = vrot.lane.b32.xlu1 %v4109_v38, %s4215_s30  ;;  %v1150_v21 = vrot.slane %v5031_v43, 2  ;;  %v2358_v23 = vsel %vm345_vm2, %v2348_v26, 0.0 }
 0x1ab   : > { %v3827_v11 = vpop.f32.mrb[30].mxu1  ;;  %v2357_v47 = vadd.f32 %v2356_v10, %v2355_v0  ;;  %v1709_v24 = vsel %vm345_vm2, %v3776_v53, 0.0  ;;  %v1738_v18 = vsel %vm345_vm2, %v1725_v36, 0.0  ;;  %v1708_v29 = vadd.f32 %v1707_v48, %v1706_v20  ;;  %4120 = vrot.lane.b32.xlu0 %v4119_v30, %s4215_s30 }
 0x1ac   : > { %v2304_v44 = vpop.f32.mrb[31].mxu1  ;;  %v3832_v60 = vpop.f32.mrb[16].mxu0  ;;  %v1711_v9 = vsel %vm345_vm2, %v3777_v50, 0.0  ;;  %v1740_v7 = vsel %vm345_vm2, %v1726_v13, 0.0  ;;  %v1736_v46 = vsel %vm345_vm2, %v1724_v61, 0.0  ;;  %v2330_v17 = vadd.f32 %v2329_v45, %v2328_v1 }
 0x1ad   : > { %v2430_v25 = vpop.f32.mrb[17].mxu0  ;;  %v1710_v56 = vadd.f32 %v1709_v24, %v1708_v29  ;;  %v1737_v8 = vadd.f32 %v1736_v46, %v1735_v19  ;;  %v2331_v37 = vsel %vm345_vm2, %v2301_v54, 0.0  ;;  %v2349_v42 = vmul.f32 %v2301_v54, %v2301_v54 }
 0x1ae   : > { %v3833_v40 = vpop.f32.mrb[18].mxu0  ;;  %v2351_v51 = vmul.f32 %v3826_v35, %v3826_v35  ;;  %v2332_v53 = vadd.f32 %v2331_v37, %v2330_v17  ;;  %v2359_v22 = vadd.f32 %v2358_v23, %v2357_v47  ;;  %v4114_v49 = vpack.i.bf16 %v3827_v11, %v3826_v35 }
 0x1af   : > { %v2433_v4 = vpop.f32.mrb[19].mxu0  ;;  %v1712_v2 = vadd.f32 %v1711_v9, %v1710_v56  ;;  %v1739_v6 = vadd.f32 %v1738_v18, %v1737_v8  ;;  %v2335_v50 = vsel %vm345_vm2, %v3826_v35, 0.0  ;;  %v2360_v41 = vsel %vm345_vm2, %v2349_v42, 0.0 }
 0x1b0   : > { %v2361_v28 = vadd.f32 %v2360_v41, %v2359_v22  ;;  %v2352_v63 = vmul.f32 %v3827_v11, %v3827_v11  ;;  %v4124_v5 = vpack.i.bf16 %v2304_v44, %v2301_v54  ;;  %v2333_v15 = vsel %vm345_vm2, %v2304_v44, 0.0  ;;  %4115 = vrot.lane.b32.xlu1 %v4114_v49, %s4216_s6 }
 0x1b1   : > { %v1713_v10 = vrot.slane %v1712_v2, 4  ;;  %v1741_v31 = vadd.f32 %v1740_v7, %v1739_v6  ;;  %v2334_v27 = vadd.f32 %v2333_v15, %v2332_v53  ;;  %v2350_v33 = vmul.f32 %v2304_v44, %v2304_v44 }
 0x1b2   : > { %v2364_v55 = vsel %vm345_vm2, %v2351_v51, 0.0  ;;  %v2337_v20 = vsel %vm345_vm2, %v3827_v11, 0.0  ;;  %v4129_v35 = vpack.i.bf16 %v3833_v40, %v3832_v60  ;;  %v4134_v52 = vpack.i.bf16 %v2433_v4, %v2430_v25  ;;  %4125 = vrot.lane.b32.xlu0 %v4124_v5, %s4216_s6 }
 0x1b3   : > { %v1714_v54 = vadd.f32 %v1713_v10, %v1712_v2  ;;  %v1742_v1 = vrot.slane %v1741_v31, 4  ;;  %v2336_v0 = vadd.f32 %v2335_v50, %v2334_v27  ;;  %v2362_v58 = vsel %vm345_vm2, %v2350_v33, 0.0 }
 0x1b4   : > { %v3836_v39 = vpop.f32.mrb[20].mxu0  ;;  %v2363_v38 = vadd.f32 %v2362_v58, %v2361_v28  ;;  %4130 = vrot.lane.b32.xlu1 %v4129_v35, %s4217_s7  ;;  %v1151_v47 = vadd.f32 %v1150_v21, %v5031_v43  ;;  %v2366_v60 = vsel %vm345_vm2, %v2352_v63, 0.0  ;;  %v1123_v23 = vrot.slane %v5045_v34, 1 }
 0x1b5   : > { %v2446_v26 = vpop.f32.mrb[21].mxu0  ;;  %v1715_v13 = vrot.slane %v1714_v54, 2  ;;  %v1743_v11 = vadd.f32 %v1742_v1, %v1741_v31  ;;  %v2338_v25 = vadd.f32 %v2337_v20, %v2336_v0 }
 0x1b6   : > { %v3837_v36 = vpop.f32.mrb[22].mxu0  ;;  %v2365_v30 = vadd.f32 %v2364_v55, %v2363_v38  ;;  %4135 = vrot.lane.b32.xlu0 %v4134_v52, %s4217_s7  ;;  %v1152_v29 = vrot.slane %v1151_v47, 1  ;;  %v1124_v17 = vadd.f32 %v1123_v23, %v5045_v34 }
 0x1b7   : > { %v2449_v19 = vpop.f32.mrb[23].mxu0  ;;  %v4139_v44 = vpack.i.bf16 %v3837_v36, %v3836_v39  ;;  %v1716_v48 = vadd.f32 %v1715_v13, %v1714_v54  ;;  %v2339_v61 = vrot.slane %v2338_v25, 4  ;;  %v1744_v40 = vrot.slane %v1743_v11, 2 }
 0x1b8   : > { %v4144_v45 = vpack.i.bf16 %v2449_v19, %v2446_v26  ;;  %v2367_v24 = vadd.f32 %v2366_v60, %v2365_v30  ;;  %v1153_v37 = vadd.f32 %v1152_v29, %v1151_v47 }
 0x1b9   : > { %4140 = vrot.lane.b32.xlu1 %v4139_v44, %s4217_s7  ;;  %v2340_v18 = vadd.f32 %v2339_v61, %v2338_v25  ;;  %v1745_v4 = vadd.f32 %v1744_v40, %v1743_v11  ;;  %v1717_v9 = vrot.slane %v1716_v48, 1 }
 0x1ba   : > { %v2368_v7 = vrot.slane %v2367_v24, 4  ;;  %4145 = vrot.lane.b32.xlu0 %v4144_v45, %s4217_s7 }
 0x1bb   : > { %v2341_v43 = vrot.slane %v2340_v18, 2  ;;  %v1746_v21 = vrot.slane %v1745_v4, 1  ;;  %v1718_v46 = vadd.f32 %v1717_v9, %v1716_v48 }
 0x1bc   : > { %v2369_v56 = vadd.f32 %v2368_v7, %v2367_v24 }
 0x1bd   : > { %v2342_v8 = vadd.f32 %v2341_v43, %v2340_v18  ;;  %v1747_v42 = vadd.f32 %v1746_v21, %v1745_v4  ;;  %v1748_v51 = vadd.f32 %v1718_v46, %v1124_v17 }
 0x1be   : > { %v2370_v53 = vrot.slane %v2369_v56, 2 }
 0x1bf   : > { %v1749_v22 = vadd.f32 %v1747_v42, %v1153_v37  ;;  %v2343_v49 = vrot.slane %v2342_v8, 1 }
 0x1c0   : > { %v2371_v2 = vadd.f32 %v2370_v53, %v2369_v56 }
 0x1c1   : > { %v2344_v6 = vadd.f32 %v2343_v49, %v2342_v8 }
 0x1c2   : > { %v2372_v50 = vrot.slane %v2371_v2, 1 }
 0x1c3   : > { %v5071_v41 = vadd.f32 %v2344_v6, %v1748_v51 }
 0x1c4   : > { %v2373_v28 = vadd.f32 %v2372_v50, %v2371_v2 }
 0x1c6   : > { %v5073_v63 = vadd.f32 %v2373_v28, %v1749_v22 }
 0x1ec   : > { %v3872_v5 = vpop.f32.mrb[24].mxu0 }
 0x1ed   : > { %v2798_v15 = vpop.f32.mrb[25].mxu0  ;;  %v2860_v10 = vmul.f32 %v3872_v5, %v3872_v5  ;;  %v2840_v52 = vsel %vm345_vm2, %v3872_v5, 0.0 }
 0x1ee   : > { %v2858_v39 = vmul.f32 %v2798_v15, %v2798_v15  ;;  %v3873_v34 = vpop.f32.mrb[26].mxu0  ;;  %v2837_v33 = vsel %vm345_vm2, %v2798_v15, 0.0 }
 0x1ef   : > { %v4149_v31 = vpack.i.bf16 %v3873_v34, %v3872_v5  ;;  %v2801_v27 = vpop.f32.mrb[27].mxu0  ;;  %v2861_v54 = vmul.f32 %v3873_v34, %v3873_v34  ;;  %v2869_v19 = vsel %vm345_vm2, %v2860_v10, 0.0  ;;  %v2842_v38 = vsel %vm345_vm2, %v3873_v34, 0.0 }
 0x1f0   : > { %v4154_v26 = vpack.i.bf16 %v2801_v27, %v2798_v15  ;;  %v2838_v55 = vsel %vm345_vm2, %v2801_v27, 0.0  ;;  %v2859_v20 = vmul.f32 %v2801_v27, %v2801_v27  ;;  %v2866_v36 = vsel %vm345_vm2, %v2858_v39, 0.0 }
 0x1f1   : > { %v2839_v35 = vadd.f32 %v2838_v55, %v2837_v33  ;;  %4150 = vrot.lane.b32.xlu1 %v4149_v31, %s4218_s8  ;;  %v2871_v11 = vsel %vm345_vm2, %v2861_v54, 0.0 }
 0x1f2   : > { %v2867_v1 = vsel %vm345_vm2, %v2859_v20, 0.0  ;;  %4155 = vrot.lane.b32.xlu0 %v4154_v26, %s4218_s8  ;;  %v4031_v20 = vpop.permute.xlu1 %4030 }
 0x1f3   : > { %v2841_v0 = vadd.f32 %v2840_v52, %v2839_v35  ;;  %v2868_v58 = vadd.f32 %v2867_v1, %v2866_v36  ;;  %v4036_v35 = vpop.permute.xlu0 %4035 }
 0x1f4   : > { %v3876_v44 = vpop.f32.mrb[28].mxu0 }
 0x1f5   : > { %v2870_v45 = vadd.f32 %v2869_v19, %v2868_v58  ;;  %v2814_v47 = vpop.f32.mrb[29].mxu0  ;;  %v2843_v13 = vadd.f32 %v2842_v38, %v2841_v0  ;;  %v2864_v29 = vmul.f32 %v3876_v44, %v3876_v44  ;;  %v2848_v21 = vsel %vm345_vm2, %v3876_v44, 0.0 }
 0x1f6   : > { %v2844_v60 = vsel %vm345_vm2, %v2814_v47, 0.0  ;;  %v2862_v25 = vmul.f32 %v2814_v47, %v2814_v47  ;;  %v3877_v30 = vpop.f32.mrb[30].mxu0  ;;  %v4041_v52 = vpop.permute.xlu1 %4040 }
 0x1f7   : > { %v2845_v48 = vadd.f32 %v2844_v60, %v2843_v13  ;;  %v2872_v61 = vadd.f32 %v2871_v11, %v2870_v45  ;;  %v4164_v40 = vpack.i.bf16 %v3877_v30, %v3876_v44  ;;  %v2817_v23 = vpop.f32.mrb[31].mxu0  ;;  %v2865_v46 = vmul.f32 %v3877_v30, %v3877_v30  ;;  %v4046_v36 = vpop.permute.xlu0 %4045 }
 0x1f8   : > { %v2873_v24 = vsel %vm345_vm2, %v2862_v25, 0.0  ;;  %v4159_v18 = vpack.i.bf16 %v2817_v23, %v2814_v47  ;;  %v2846_v9 = vsel %vm345_vm2, %v2817_v23, 0.0  ;;  %v2863_v7 = vmul.f32 %v2817_v23, %v2817_v23 }
 0x1f9   : > { %v2874_v4 = vadd.f32 %v2873_v24, %v2872_v61  ;;  %4165 = vrot.lane.b32.xlu1 %v4164_v40, %s4218_s8  ;;  %v2847_v43 = vadd.f32 %v2846_v9, %v2845_v48  ;;  %v2877_v37 = vsel %vm345_vm2, %v2864_v29, 0.0  ;;  %v2850_v42 = vsel %vm345_vm2, %v3877_v30, 0.0 }
 0x1fa   : > { %4160 = vrot.lane.b32.xlu0 %v4159_v18, %s4218_s8  ;;  %v2875_v17 = vsel %vm345_vm2, %v2863_v7, 0.0  ;;  %v2879_v22 = vsel %vm345_vm2, %v2865_v46, 0.0  ;;  %v4051_v54 = vpop.permute.xlu1 %4050  ;;  %v4033_v60 = vunpack.i.h.bf16 %v4031_v20  ;;  %v4032_v25 = vunpack.i.l.bf16 %v4031_v20 }
 0x1fb   : > { %v2849_v56 = vadd.f32 %v2848_v21, %v2847_v43  ;;  %v2876_v8 = vadd.f32 %v2875_v17, %v2874_v4  ;;  %v4061_v1 = vpop.permute.xlu0 %4060  ;;  %v4038_v48 = vunpack.i.h.bf16 %v4036_v35  ;;  %v4037_v61 = vunpack.i.l.bf16 %v4036_v35 }
 0x1fc   : > { %v4043_v40 = vunpack.i.h.bf16 %v4041_v52  ;;  %v4042_v23 = vunpack.i.l.bf16 %v4041_v52  ;;  %v4048_v24 = vunpack.i.h.bf16 %v4046_v36  ;;  %v4047_v18 = vunpack.i.l.bf16 %v4046_v36 }
 0x1fd   : > { %v2851_v51 = vadd.f32 %v2850_v42, %v2849_v56  ;;  %v2878_v53 = vadd.f32 %v2877_v37, %v2876_v8  ;;  %v3116_v29 = vsel %vm345_vm2, %v4932_v57, %v4033_v60  ;;  %v3115_v4 = vsel %vm345_vm2, %v4923_v32, %v4032_v25 }
 0x1fe   : > { %v5100_v0 = vpop.permute.xlu1 %4055  ;;  %v4053_v9 = vunpack.i.h.bf16 %v4051_v54  ;;  %v4052_v7 = vunpack.i.l.bf16 %v4051_v54  ;;  %v3114_v43 = vsel %vm345_vm2, %v4936_v62, %v4038_v48  ;;  %v3113_v21 = vsel %vm345_vm2, %v4928_v59, %v4037_v61 }
 0x1ff   : > { %v2852_v49 = vrot.slane %v2851_v51, 4  ;;  %v2880_v2 = vadd.f32 %v2879_v22, %v2878_v53  ;;  %v5102_v58 = vpop.permute.xlu0 %4065  ;;  %v4063_v46 = vunpack.i.h.bf16 %v4061_v1  ;;  %v4062_v17 = vunpack.i.l.bf16 %v4061_v1 }
 0x200   : > { %v3120_v8 = vsel %vm345_vm2, %v4945_v12, %v4043_v40  ;;  %v3119_v57 = vsel %vm345_vm2, %v4939_v16, %v4042_v23  ;;  %v3118_v32 = vsel %vm345_vm2, %v4949_v14, %v4048_v24  ;;  %v3117_v62 = vsel %vm345_vm2, %v4941_v3, %v4047_v18 }
 0x201   : > { %v2853_v6 = vadd.f32 %v2852_v49, %v2851_v51  ;;  %v2881_v50 = vrot.slane %v2880_v2, 4  ;;  %v3124_v22 = vsel %vm573_vm5, %v3116_v29, %v4053_v9  ;;  %v3123_v12 = vsel %vm573_vm5, %v3115_v4, %v4052_v7 }
 0x202   : > { %v4071_v19 = vpop.permute.xlu1 %4070  ;;  %v3122_v16 = vsel %vm573_vm5, %v3114_v43, %v4063_v46  ;;  %v3121_v14 = vsel %vm573_vm5, %v3113_v21, %v4062_v17  ;;  %v4058_v3 = vunpack.i.h.bf16 %v5100_v0 }
 0x203   : > { %v2854_v28 = vrot.slane %v2853_v6, 2  ;;  %v2882_v5 = vadd.f32 %v2881_v50, %v2880_v2  ;;  %v4081_v38 = vpop.permute.xlu0 %4080  ;;  %v4073_v59 = vunpack.i.h.bf16 %v4071_v19  ;;  %v4072_v42 = vunpack.i.l.bf16 %v4071_v19 }
 0x204   : > { %v4083_v51 = vunpack.i.h.bf16 %v4081_v38  ;;  %v4082_v53 = vunpack.i.l.bf16 %v4081_v38 }
 0x205   : > { %v2883_v15 = vrot.slane %v2882_v5, 2  ;;  %v2855_v39 = vadd.f32 %v2854_v28, %v2853_v6  ;;  %v4057_v28 = vunpack.i.l.bf16 %v5100_v0 }
 0x206   : > { %v5104_v44 = vpop.permute.xlu1 %4075 }
 0x207   : > { %v2884_v34 = vadd.f32 %v2883_v15, %v2882_v5  ;;  %v2856_v10 = vrot.slane %v2855_v39, 1  ;;  %v4068_v5 = vunpack.i.h.bf16 %v5102_v58  ;;  %v4067_v15 = vunpack.i.l.bf16 %v5102_v58 }
 0x209   : > { %v2885_v31 = vrot.slane %v2884_v34, 1  ;;  %v2857_v27 = vadd.f32 %v2856_v10, %v2855_v39  ;;  %v3128_v39 = vsel %vm573_vm5, %v3120_v8, %v4073_v59  ;;  %v3126_v10 = vsel %vm573_vm5, %v3118_v32, %v4083_v51 }
 0x20b   : > { %v2886_v33 = vadd.f32 %v2885_v31, %v2884_v34  ;;  %v5096_v26 = vadd.f32 %v2857_v27, %v5071_v41  ;;  %v5106_v41 = vpop.permute.xlu0 %4085  ;;  %v3127_v34 = vsel %vm573_vm5, %v3119_v57, %v4072_v42  ;;  %v3125_v31 = vsel %vm573_vm5, %v3117_v62, %v4082_v53 }
 0x20c   : > { %v4088_v58 = vunpack.i.h.bf16 %v5106_v41  ;;  %v4087_v19 = vunpack.i.l.bf16 %v5106_v41 }
 0x20d   : > { %v2888_v55 = vadd.f32 %v2886_v33, %v5073_v63  ;;  %v4078_v33 = vunpack.i.h.bf16 %v5104_v44 }
 0x20f   : > { %3192 = vrot.lane.b32.xlu0 %v2888_v55, %s4212_s12  ;;  %v4077_v55 = vunpack.i.l.bf16 %v5104_v44 }
 0x213   : > { %v4091_v45 = vpop.permute.xlu1 %4090 }
 0x214   : > { %v4101_v63 = vpop.permute.xlu0 %4100  ;;  %v4093_v49 = vunpack.i.h.bf16 %v4091_v45  ;;  %v4092_v2 = vunpack.i.l.bf16 %v4091_v45 }
 0x215   : > { %v4103_v6 = vunpack.i.h.bf16 %v4101_v63  ;;  %v4102_v50 = vunpack.i.l.bf16 %v4101_v63 }
 0x216   : > { %v3133_v20 = vsel %vm3129_vm10, %v3124_v22, %v4093_v49  ;;  %v3132_v35 = vsel %vm3129_vm10, %v3123_v12, %v4092_v2 }
 0x217   : > { %v3131_v36 = vsel %vm3129_vm10, %v3122_v16, %v4103_v6  ;;  %v3130_v54 = vsel %vm3129_vm10, %v3121_v14, %v4102_v50  ;;  %v3142_v40 = vsel %vm3138_vm11, %v3133_v20, %v4058_v3 }
 0x218   : > { %v5108_v47 = vpop.permute.xlu1 %4095  ;;  %v3139_v23 = vsel %vm3138_vm11, %v3130_v54, %v4067_v15  ;;  %v3140_v24 = vsel %vm3138_vm11, %v3131_v36, %v4068_v5 }
 0x219   : > { %v5110_v13 = vpop.permute.xlu0 %4105  ;;  %v4098_v1 = vunpack.i.h.bf16 %v5108_v47  ;;  %v4097_v0 = vunpack.i.l.bf16 %v5108_v47  ;;  %v3141_v47 = vsel %vm3138_vm11, %v3132_v35, %v4057_v28 }
 0x21a   : > { %v4108_v38 = vunpack.i.h.bf16 %v5110_v13  ;;  %v4107_v45 = vunpack.i.l.bf16 %v5110_v13 }
 0x21b   : > { %v3151_v18 = vsel %vm3147_vm12, %v3142_v40, %v4098_v1 }
 0x21c   : > { %v5112_v11 = vpop.permute.xlu1 %4110  ;;  %v3148_v9 = vsel %vm3147_vm12, %v3139_v23, %v4107_v45 }
 0x21d   : > { %v5114_v30 = vpop.permute.xlu0 %4120  ;;  %v4113_v63 = vunpack.i.h.bf16 %v5112_v11  ;;  %v4112_v60 = vunpack.i.l.bf16 %v5112_v11  ;;  %v3150_v11 = vsel %vm3147_vm12, %v3141_v47, %v4097_v0 }
 0x21e   : > { %v4123_v25 = vunpack.i.h.bf16 %v5114_v30  ;;  %v4122_v48 = vunpack.i.l.bf16 %v5114_v30  ;;  %v3149_v30 = vsel %vm3147_vm12, %v3140_v24, %v4108_v38 }
 0x21f   : > { %v3137_v21 = vsel %vm3129_vm10, %v3128_v39, %v4113_v63  ;;  %v3136_v46 = vsel %vm3129_vm10, %v3127_v34, %v4112_v60 }
 0x220   : > { %v3135_v17 = vsel %vm3129_vm10, %v3126_v10, %v4123_v25  ;;  %v3134_v8 = vsel %vm3129_vm10, %v3125_v31, %v4122_v48  ;;  %v3146_v20 = vsel %vm3138_vm11, %v3137_v21, %v4078_v33 }
 0x221   : > { %v3143_v54 = vsel %vm3138_vm11, %v3134_v8, %v4087_v19  ;;  %v3144_v44 = vsel %vm3138_vm11, %v3135_v17, %v4088_v58 }
 0x222   : > { %v5124_v56 = vpop.permute.xlu1 %4115 }
 0x223   : > { %v4118_v32 = vunpack.i.h.bf16 %v5124_v56  ;;  %v4117_v62 = vunpack.i.l.bf16 %v5124_v56 }
 0x224   : > { %v5134_v37 = vpop.permute.xlu0 %4125 }
 0x225   : > { %v4128_v5 = vunpack.i.h.bf16 %v5134_v37  ;;  %v4127_v15 = vunpack.i.l.bf16 %v5134_v37 }
 0x226   : > { %v4131_v27 = vpop.permute.xlu1 %4130 }
 0x227   : > { %v4133_v29 = vunpack.i.h.bf16 %v4131_v27  ;;  %v4132_v4 = vunpack.i.l.bf16 %v4131_v27  ;;  %v3145_v27 = vsel %vm3138_vm11, %v3136_v46, %v4077_v55  ;;  %v3153_v33 = vsel %vm3147_vm12, %v3144_v44, %v4128_v5 }
 0x228   : > { %v4136_v52 = vpop.permute.xlu0 %4135  ;;  %v3154_v36 = vsel %vm3147_vm12, %v3145_v27, %v4117_v62  ;;  %v3152_v1 = vsel %vm3147_vm12, %v3143_v54, %v4127_v15 }
 0x229   : > { %v4138_v7 = vunpack.i.h.bf16 %v4136_v52  ;;  %v4137_v43 = vunpack.i.l.bf16 %v4136_v52  ;;  %v3160_v53 = vsel %vm3156_vm13, %v3151_v18, %v4133_v29  ;;  %v3159_v22 = vsel %vm3156_vm13, %v3150_v11, %v4132_v4 }
 0x22a   : > { %v3155_v52 = vsel %vm3147_vm12, %v3146_v20, %v4118_v32 }
 0x22b   : > { %v5164_v61 = vpop.permute.xlu1 %4140  ;;  %v3158_v2 = vsel %vm3156_vm13, %v3149_v30, %v4138_v7  ;;  %v3157_v56 = vsel %vm3156_vm13, %v3148_v9, %v4137_v43 }
 0x22c   : > { %v5170_v13 = vpop.permute.xlu0 %4145  ;;  %v4143_v10 = vunpack.i.h.bf16 %v5164_v61  ;;  %v4142_v31 = vunpack.i.l.bf16 %v5164_v61 }
 0x22d   : > { %v4148_v37 = vunpack.i.h.bf16 %v5170_v13  ;;  %v4147_v35 = vunpack.i.l.bf16 %v5170_v13 }
 0x22e   : > { %v3163_v63 = vsel %vm3156_vm13, %v3154_v36, %v4142_v31  ;;  %v3164_v60 = vsel %vm3156_vm13, %v3155_v52, %v4143_v10 }
 0x22f   : > { %v3161_v58 = vsel %vm3156_vm13, %v3152_v1, %v4147_v35  ;;  %v3162_v25 = vsel %vm3156_vm13, %v3153_v33, %v4148_v37 }
 0x263   : > { %v4151_v57 = vpop.permute.xlu1 %4150 }
 0x264   : > { %v4153_v59 = vunpack.i.h.bf16 %v4151_v57  ;;  %v4152_v42 = vunpack.i.l.bf16 %v4151_v57  ;;  %v4156_v51 = vpop.permute.xlu0 %4155 }
 0x265   : > { %v4158_v12 = vunpack.i.h.bf16 %v4156_v51  ;;  %v4157_v49 = vunpack.i.l.bf16 %v4156_v51 }
 0x266   : > { %v3168_v16 = vsel %vm3165_vm14, %v3159_v22, %v4152_v42  ;;  %v3169_v14 = vsel %vm3165_vm14, %v3160_v53, %v4153_v59 }
 0x267   : > { %v3176_v6 = vpack.c.bf16 %v3168_v16, %v3168_v16  ;;  %v3177_v50 = vpack.c.bf16 %v3169_v14, %v3169_v14  ;;  %v3166_v3 = vsel %vm3165_vm14, %v3157_v56, %v4157_v49  ;;  %v3167_v28 = vsel %vm3165_vm14, %v3158_v2, %v4158_v12 }
 0x268   : > { %v3174_v39 = vpack.c.bf16 %v3166_v3, %v3166_v3  ;;  %v3175_v34 = vpack.c.bf16 %v3167_v28, %v3167_v28 }
 0x269   : > { %3185 = vst.msk [vmem:[%s5189_s11 + $0x8] sm:$0xf] %vm3182_vm15, %v3176_v6  ;;  %3186 = vst.msk [vmem:[%s5189_s11 + $0xc] sm:$0xf] %vm3182_vm15, %v3177_v50 }
 0x26a   : > { %3183 = vst.msk [vmem:[%s5189_s11] sm:$0xf] %vm3182_vm15, %v3174_v39  ;;  %3184 = vst.msk [vmem:[%s5189_s11 + $0x4] sm:$0xf] %vm3182_vm15, %v3175_v34 }
 0x26b   : > { %v4166_v55 = vpop.permute.xlu1 %4165 }
 0x26c   : > { %v4168_v0 = vunpack.i.h.bf16 %v4166_v55  ;;  %v4167_v38 = vunpack.i.l.bf16 %v4166_v55  ;;  %v4161_v45 = vpop.permute.xlu0 %4160 }
 0x26d   : > { %v4163_v19 = vunpack.i.h.bf16 %v4161_v45  ;;  %v4162_v41 = vunpack.i.l.bf16 %v4161_v45 }
 0x26e   : > { %v3172_v48 = vsel %vm3165_vm14, %v3163_v63, %v4167_v38  ;;  %v3173_v61 = vsel %vm3165_vm14, %v3164_v60, %v4168_v0 }
 0x26f   : > { %v3180_v47 = vpack.c.bf16 %v3172_v48, %v3172_v48  ;;  %v3181_v40 = vpack.c.bf16 %v3173_v61, %v3173_v61  ;;  %v3170_v23 = vsel %vm3165_vm14, %v3161_v58, %v4162_v41  ;;  %v3171_v24 = vsel %vm3165_vm14, %v3162_v25, %v4163_v19 }
 0x270   : > { %v3178_v13 = vpack.c.bf16 %v3170_v23, %v3170_v23  ;;  %v3179_v18 = vpack.c.bf16 %v3171_v24, %v3171_v24 }
 0x271   : > { %3189 = vst.msk [vmem:[%s5189_s11 + $0x18] sm:$0xf] %vm3182_vm15, %v3180_v47  ;;  %3190 = vst.msk [vmem:[%s5189_s11 + $0x1c] sm:$0xf] %vm3182_vm15, %v3181_v40 }
 0x272   : > { %3187 = vst.msk [vmem:[%s5189_s11 + $0x10] sm:$0xf] %vm3182_vm15, %v3178_v13  ;;  %3188 = vst.msk [vmem:[%s5189_s11 + $0x14] sm:$0xf] %vm3182_vm15, %v3179_v18 }
 0x281   : > { %v3193_v11 = vpop.permute.xlu0 %3192 }
 0x282   : > { %v3195_v29 = vsel %vm345_vm2, %v5096_v26, %v3193_v11 }
 0x283   : > { %3197 = vst.msk [vmem:[%s314_s14] sm:$0x1] %vm3196_vm0, %v3195_v29 }
 0x284 PF: > { %s16_s20 = sadd.s32 1, %s4207_s20   ;;  %s5266_s18 = smov %s4203_s19 }
 0x285   : > { %p13_p5 = scmp.ge.s32.totalorder %s16_s20, 4   ;;  %s5267_s19 = smov %s5269_s21 }
 0x287   :  { %15 = sbr.rel (!%p13_p5) target bundleno = 2 (0x2), region = 98 }

</bundles_post_ra>
